<compile_context>
chip_gen: v7x
topology: tpu7x:2x2x1
jax: 0.10.0
libtpu: 0.0.40
codegen_flags: <defaults>
</compile_context>

<pallas_src>
import jax
import jax.numpy as jnp
from jax.experimental import pallas as pl
from jax.experimental.pallas import tpu as pltpu

VMEM_LIMIT_BYTES = 48 * 1024 * 1024   # > v5e 16MiB default, < v7x 64MiB physical
TB_MAX = 256                           # batch-tile rows presented to the MXU
TC_MAX = 16                            # timesteps per grid step (time chunk)


# --------------------------------------------------------------------------
# small helpers
# --------------------------------------------------------------------------
def _round_up(x, m):
    return -(-x // m) * m


def _pad_axis(x, axis, new_size):
    old = x.shape[axis]
    if new_size == old:
        return x
    pad = [(0, 0)] * x.ndim
    pad[axis] = (0, new_size - old)
    return jnp.pad(x, pad)


def _batch_tiling(b):
    bp = _round_up(max(b, 1), 8)       # sublane alignment
    tb = min(bp, TB_MAX)
    bp = _round_up(bp, tb)
    return tb, bp


def _time_tiling(t):
    tc = min(max(t, 1), TC_MAX)
    tp = _round_up(t, tc)
    return tc, tp


# --------------------------------------------------------------------------
# Encoder kernel: masked GRU over a Tc-chunk of the source sequence.
# grid = (B_tiles, T_chunks); hidden state carried in VMEM scratch across the
# (innermost, "arbitrary") time axis. x-path gates (x@Wx + bx + bh, fused
# r|z|n) are precomputed outside, so each step does ONE matmul (h @ Wh).
# --------------------------------------------------------------------------
def encoder_gru_kernel(gx_ref, m_ref, wh_ref, states_ref, h_final_ref, h_sc):
    tblk = pl.program_id(1)

    @pl.when(tblk == 0)
    def _():
        h_sc[...] = jnp.zeros(h_sc.shape, h_sc.dtype)

    wh = wh_ref[...]                       # (H, 3H)
    H = h_sc.shape[-1]
    tc = gx_ref.shape[0]

    h = h_sc[...]                          # (tb, H)
    # statically unrolled time chunk (tc is a compile-time block constant)
    for s in range(tc):
        gx = gx_ref[s]                     # (tb, 3H) precomputed x-path gates
        m = m_ref[s]                       # (tb, 1)
        gh = jnp.dot(h, wh, preferred_element_type=jnp.float32)
        r = jax.nn.sigmoid(gx[:, :H] + gh[:, :H])
        z = jax.nn.sigmoid(gx[:, H:2 * H] + gh[:, H:2 * H])
        n = jnp.tanh(gx[:, 2 * H:] + r * gh[:, 2 * H:])
        h_new = (1.0 - z) * n + z * h
        h = m * h_new + (1.0 - m) * h      # keep previous hidden at padding
        states_ref[s] = h

    h_sc[...] = h

    @pl.when(tblk == pl.num_programs(1) - 1)
    def _():
        h_final_ref[...] = h


def run_encoder(gx_tbg, m_tb1, wh, tb, tc):
    Tsp, Bp, G = gx_tbg.shape
    H = wh.shape[0]
    nb, nt = Bp // tb, Tsp // tc
    states, h_final = pl.pallas_call(
        encoder_gru_kernel,
        out_shape=(
            jax.ShapeDtypeStruct((Tsp, Bp, H), jnp.float32),
            jax.ShapeDtypeStruct((Bp, H), jnp.float32),
        ),
        grid_spec=pltpu.PrefetchScalarGridSpec(
            num_scalar_prefetch=0,
            grid=(nb, nt),
            in_specs=[
                pl.BlockSpec((tc, tb, G), lambda b, t: (t, b, 0)),   # gx chunk
                pl.BlockSpec((tc, tb, 1), lambda b, t: (t, b, 0)),   # src mask
                pl.BlockSpec((H, G), lambda b, t: (0, 0)),           # W_h fused
            ],
            out_specs=[
                pl.BlockSpec((tc, tb, H), lambda b, t: (t, b, 0)),   # states
                pl.BlockSpec((tb, H), lambda b, t: (b, 0)),          # final h
            ],
            scratch_shapes=[pltpu.VMEM((tb, H), jnp.float32)],
        ),
        compiler_params=pltpu.CompilerParams(
            dimension_semantics=("parallel", "arbitrary"),
            vmem_limit_bytes=VMEM_LIMIT_BYTES),
    )(gx_tbg, m_tb1, wh)
    return states, h_final


# --------------------------------------------------------------------------
# Decoder kernel: masked GRU + dot-product attention over encoder states for a
# Tc-chunk of target steps. Per step: one batched matvec for scores, softmax,
# one batched matvec probs @ encW (ctx-path gates, Wxc folded OUTSIDE the
# loop), one (tb,H)x(H,3H) matmul h @ Wh, then the off-critical-path
# ctx = probs @ enc.  Emits a single fused (tb, 2H) = [h | ctx] store per step;
# the vocab projection happens outside the serial loop.
# --------------------------------------------------------------------------
def decoder_attn_gru_kernel(gy_ref, m_ref, enc_ref, encw_ref, am_ref, h0_ref,
                            wh_ref, hc_ref, h_sc):
    tblk = pl.program_id(1)

    @pl.when(tblk == 0)
    def _():
        h_sc[...] = h0_ref[...]

    wh = wh_ref[...]                       # (H, 3H)
    enc = enc_ref[...]                     # (tb, Ts, H)   time-invariant block
    encw = encw_ref[...]                   # (tb, Ts, 3H)  enc @ Wxc, precomputed
    H = h_sc.shape[-1]
    tc = gy_ref.shape[0]
    scale = 1.0 / (float(H) ** 0.5)
    # additive attention mask, hoisted out of the time loop
    am_bias = jnp.where(am_ref[...] > 0.0, jnp.float32(0.0),
                        jnp.float32(-1e9))[:, None, :]      # (tb, 1, Ts)

    h = h_sc[...]                          # (tb, H)
    for s in range(tc):                    # statically unrolled time chunk
        # ---- scaled dot-product attention (batched matvec on the MXU) ----
        scores = jnp.einsum("bqh,bth->bqt", h[:, None, :], enc,
                            preferred_element_type=jnp.float32) * scale + am_bias
        s_max = jnp.max(scores, axis=-1, keepdims=True)
        e = jnp.exp(scores - s_max)
        denom = jnp.sum(e, axis=-1, keepdims=True)
        probs = e * pl.reciprocal(denom, approx=True)        # (tb, 1, Ts)

        # ---- ctx-path gates via precomputed encW (removes ctx@Wxc from the
        #      serial dependent-matmul chain) ----
        g_ctx = jnp.einsum("bqt,btg->bqg", probs, encw,
                           preferred_element_type=jnp.float32)[:, 0, :]
        gh = jnp.dot(h, wh, preferred_element_type=jnp.float32)
        gx = gy_ref[s] + g_ctx             # (tb, 3H)
        r = jax.nn.sigmoid(gx[:, :H] + gh[:, :H])
        z = jax.nn.sigmoid(gx[:, H:2 * H] + gh[:, H:2 * H])
        n = jnp.tanh(gx[:, 2 * H:] + r * gh[:, 2 * H:])
        m = m_ref[s]                       # (tb, 1)
        h_new = (1.0 - z) * n + z * h
        h_new = m * h_new + (1.0 - m) * h

        # ---- context vector (only needed for logits; off the h critical path)
        ctx = jnp.einsum("bqt,bth->bqh", probs, enc,
                         preferred_element_type=jnp.float32)[:, 0, :]

        # single fused lane-dense store: [h | ctx]
        hc_ref[s] = jnp.concatenate([h_new, ctx], axis=-1)
        h = h_new

    h_sc[...] = h


def run_decoder(gy_tbg, m_tb1, enc_bth, encw_btg, attn_mask_bt, h0, wh, tb, tc):
    Ttp, Bp, G = gy_tbg.shape
    H = wh.shape[0]
    Tsp = enc_bth.shape[1]
    nb, nt = Bp // tb, Ttp // tc
    # NOTE: enc/encW/attn-mask/h0/Wh block indices are time-invariant, so the
    # pipeline does not re-DMA them along the inner ("arbitrary") time axis.
    # TODO(synk): single-buffer them (pipeline_mode=pl.Buffered(1)) to halve
    #             their VMEM footprint once that API is confirmed stable.
    hc = pl.pallas_call(
        decoder_attn_gru_kernel,
        out_shape=jax.ShapeDtypeStruct((Ttp, Bp, 2 * H), jnp.float32),
        grid_spec=pltpu.PrefetchScalarGridSpec(
            num_scalar_prefetch=0,
            grid=(nb, nt),
            in_specs=[
                pl.BlockSpec((tc, tb, G), lambda b, t: (t, b, 0)),    # gy chunk
                pl.BlockSpec((tc, tb, 1), lambda b, t: (t, b, 0)),    # trg mask
                pl.BlockSpec((tb, Tsp, H), lambda b, t: (b, 0, 0)),   # enc states
                pl.BlockSpec((tb, Tsp, G), lambda b, t: (b, 0, 0)),   # enc @ Wxc
                pl.BlockSpec((tb, Tsp), lambda b, t: (b, 0)),         # attn mask
                pl.BlockSpec((tb, H), lambda b, t: (b, 0)),           # h0
                pl.BlockSpec((H, G), lambda b, t: (0, 0)),            # W_h fused
            ],
            out_specs=pl.BlockSpec((tc, tb, 2 * H), lambda b, t: (t, b, 0)),
            scratch_shapes=[pltpu.VMEM((tb, H), jnp.float32)],
        ),
        compiler_params=pltpu.CompilerParams(
            dimension_semantics=("parallel", "arbitrary"),
            vmem_limit_bytes=VMEM_LIMIT_BYTES),
    )(gy_tbg, m_tb1, enc_bth, encw_btg, attn_mask_bt, h0, wh)
    return hc


# --------------------------------------------------------------------------
# Model wrapper (mirrors the PyTorch Seq2Seq_model forward signature).
# --------------------------------------------------------------------------
class Seq2SeqModelPallas:
    def __init__(self, attributes, config, key):
        self.config = dict(config)
        self.UNK_id = attributes["unk_id"]
        self.config["vocab_len"] = attributes["vocab_len"]
        self.config["pad_id"] = attributes["pad_id"]
        self.config["sep_id"] = attributes["sep_id"]
        self.config["unk_id"] = attributes["unk_id"]

        V = self.config["vocab_len"]
        E = self.config["emb_dim"]
        H = self.config["hidden_dim"]

        keys = jax.random.split(key, 8)
        s = 0.1
        self.params = {
            "embedding": s * jax.random.normal(keys[0], (V, E), jnp.float32),
            # gate weights fused r|z|n along the last axis -> (K, 3H)
            "enc_wx": s * jax.random.normal(keys[1], (E, 3 * H), jnp.float32),
            "enc_wh": s * jax.random.normal(keys[2], (H, 3 * H), jnp.float32),
            "enc_bx": jnp.zeros((1, 3 * H), jnp.float32),
            "enc_bh": jnp.zeros((1, 3 * H), jnp.float32),
            "dec_wxe": s * jax.random.normal(keys[3], (E, 3 * H), jnp.float32),
            "dec_wxc": s * jax.random.normal(keys[4], (H, 3 * H), jnp.float32),
            "dec_wh": s * jax.random.normal(keys[5], (H, 3 * H), jnp.float32),
            "dec_bx": jnp.zeros((1, 3 * H), jnp.float32),
            "dec_bh": jnp.zeros((1, 3 * H), jnp.float32),
            # output projection on [h | ctx] -> (2H, V), hoisted out of the loop
            "out_w": s * jax.random.normal(keys[6], (2 * H, V), jnp.float32),
            "out_b": jnp.zeros((1, V), jnp.float32),
        }

    def __call__(self, batch):
        trg = batch.get("trg_vec", None)
        trg_mask = batch.get("trg_mask", None)
        src = batch["src_vec"]                          # (B, Ts) int32
        src_mask = batch["src_mask"].astype(jnp.float32)

        p = self.params
        B, Ts = src.shape

        tb, Bp = _batch_tiling(B)
        tc_s, Tsp = _time_tiling(Ts)

        src_p = _pad_axis(src, 0, Bp)
        src_mask_p = _pad_axis(src_mask, 0, Bp)         # (Bp, Ts)

        emb = p["embedding"]

        # Hoisted encoder input-path gates, built directly TIME-MAJOR (only the
        # tiny int32 id matrix is transposed, never a big activation tensor);
        # the h-path bias is folded in here so the kernel does gh = h @ Wh only.
        src_ids_t = jnp.transpose(src_p)                                 # (Ts, Bp)
        gx = (jnp.einsum("tbe,eg->tbg", emb[src_ids_t], p["enc_wx"])
              + p["enc_bx"] + p["enc_bh"])                               # (Ts, Bp, 3H)
        gx = _pad_axis(gx, 0, Tsp)
        m_src_t = _pad_axis(jnp.transpose(src_mask_p)[..., None], 0, Tsp)

        enc_states_t, enc_final = run_encoder(gx, m_src_t, p["enc_wh"], tb, tc_s)

        # one batch-major copy: needed for the returned encoder_states anyway
        # and reused as the decoder's batched-attention layout.
        enc_bth = jnp.transpose(enc_states_t, (1, 0, 2))                 # (Bp, Tsp, H)

        sequence_dict = {
            "encoder_states": enc_bth[:B, :Ts] * src_mask[..., None],
            "encoder_final": enc_final[:B],
        }

        if trg is not None:
            trg_mask = trg_mask.astype(jnp.float32)
            Tt = trg.shape[1]
            tc_t, Ttp = _time_tiling(Tt)

            trg_p = _pad_axis(trg, 0, Bp)
            trg_mask_p = _pad_axis(trg_mask, 0, Bp)

            trg_ids_t = jnp.transpose(trg_p)                             # (Tt, Bp)
            gy = (jnp.einsum("tbe,eg->tbg", emb[trg_ids_t], p["dec_wxe"])
                  + p["dec_bx"] + p["dec_bh"])                           # (Tt, Bp, 3H)
            gy = _pad_axis(gy, 0, Ttp)
            m_trg_t = _pad_axis(jnp.transpose(trg_mask_p)[..., None], 0, Ttp)

            attn_mask = _pad_axis(src_mask_p, 1, Tsp)                    # (Bp, Tsp)

            # Hoisted ctx-path gate weights: encW = enc_states @ Wxc, so the
            # serial loop computes probs @ encW (one dependent matmul fewer).
            encw = jnp.einsum("bth,hg->btg", enc_bth, p["dec_wxc"])      # (Bp, Tsp, 3H)

            hc = run_decoder(gy, m_trg_t, enc_bth, encw, attn_mask,
                             enc_final, p["dec_wh"], tb, tc_t)           # (Ttp, Bp, 2H)

            # Hoisted vocab projection, time-major; slice BEFORE transposing.
            logits_t = jnp.einsum("tbh,hv->tbv", hc, p["out_w"]) + p["out_b"]
            sequence_dict["logits"] = jnp.transpose(logits_t[:Tt, :B], (1, 0, 2))

        return sequence_dict


if __name__ == "__main__":
    B, Ts, Tt = 2, 8, 8
    attributes = {"unk_id": 2, "vocab_len": 64, "pad_id": 0, "sep_id": 1}
    # hidden_dim chosen as a multiple of 128 so the fused r|z|n gate slices and
    # the [h | ctx] output are lane-tile aligned.
    config = {"emb_dim": 64, "hidden_dim": 128}

    root = jax.random.PRNGKey(0)
    k_model, k_src, k_trg = jax.random.split(root, 3)

    model = Seq2SeqModelPallas(attributes, config, k_model)

    src = jax.random.randint(k_src, (B, Ts), 3, attributes["vocab_len"], dtype=jnp.int32)
    trg = jax.random.randint(k_trg, (B, Tt), 3, attributes["vocab_len"], dtype=jnp.int32)
    src_lens = jnp.array([8, 6], dtype=jnp.int32)
    trg_lens = jnp.array([8, 5], dtype=jnp.int32)
    src_mask = (jnp.arange(Ts)[None, :] < src_lens[:, None]).astype(jnp.float32)
    trg_mask = (jnp.arange(Tt)[None, :] < trg_lens[:, None]).astype(jnp.float32)

    batch = {"src_vec": src, "src_mask": src_mask,
             "trg_vec": trg, "trg_mask": trg_mask}

    out = model(batch)
    jax.block_until_ready(out["logits"])
    assert out["logits"].shape == (B, Tt, attributes["vocab_len"])
    assert out["encoder_states"].shape == (B, Ts, config["hidden_dim"])
    assert out["encoder_final"].shape == (B, config["hidden_dim"])
    assert bool(jnp.isfinite(out["logits"]).all())
    print("KERNEL_OK")
</pallas_src>

<mosaic_0001>
module attributes {stable_mosaic.version = 11 : i64} {
  func.func @encoder_gru_kernel(%arg0: i32, %arg1: i32, %arg2: memref<8x8x384xf32, #tpu.memory_space<vmem>>, %arg3: memref<8x8x1xf32, #tpu.memory_space<vmem>>, %arg4: memref<128x384xf32, #tpu.memory_space<vmem>>, %arg5: memref<8x8x128xf32, #tpu.memory_space<vmem>>, %arg6: memref<8x128xf32, #tpu.memory_space<vmem>>, %arg7: memref<8x128xf32, #tpu.memory_space<vmem>>) attributes {dimension_semantics = [#tpu.dimension_semantics<parallel>, #tpu.dimension_semantics<arbitrary>], iteration_bounds = array<i64: 1, 1>, scalar_prefetch = 0 : i64, scratch_operands = 1 : i64, tpu.core_type = #tpu.core_type<tc>, window_params = [{transform_indices = @transform_0, window_bounds = array<i64: 8, 8, 384>}, {transform_indices = @transform_1, window_bounds = array<i64: 8, 8, 1>}, {pipeline_mode = #tpu.pipeline_mode<synchronous>, transform_indices = @transform_2, window_bounds = array<i64: 128, 384>}, {transform_indices = @transform_3, window_bounds = array<i64: 8, 8, 128>}, {transform_indices = @transform_4, window_bounds = array<i64: 8, 128>}]} {
    %c0_i32 = arith.constant 0 : i32
    %0 = arith.cmpi eq, %arg1, %c0_i32 : i32
    %1 = arith.extui %0 : i1 to i32
    %c0_i32_0 = arith.constant 0 : i32
    %2 = arith.cmpi ne, %1, %c0_i32_0 : i32
    scf.if %2 {
      %cst_112 = arith.constant 0.000000e+00 : f32
      %337 = vector.broadcast %cst_112 : f32 to vector<8x128xf32>
      %c0_113 = arith.constant 0 : index
      %c0_114 = arith.constant 0 : index
      %338 = vector.load %arg7[%c0_113, %c0_114] : memref<8x128xf32, #tpu.memory_space<vmem>>, vector<8x128xf32>
      tpu.vector_store %arg7[%c0_113, %c0_114], %337 {strides = array<i32>} : memref<8x128xf32, #tpu.memory_space<vmem>>, vector<8x128xf32>,
    } else {
    }
    %c0 = arith.constant 0 : index
    %c0_1 = arith.constant 0 : index
    %3 = vector.load %arg4[%c0, %c0_1] : memref<128x384xf32, #tpu.memory_space<vmem>>, vector<128x384xf32>
    %c0_2 = arith.constant 0 : index
    %c0_3 = arith.constant 0 : index
    %4 = vector.load %arg7[%c0_2, %c0_3] : memref<8x128xf32, #tpu.memory_space<vmem>>, vector<8x128xf32>
    %c0_4 = arith.constant 0 : index
    %c0_5 = arith.constant 0 : index
    %c0_6 = arith.constant 0 : index
    %5 = vector.load %arg2[%c0_4, %c0_5, %c0_6] : memref<8x8x384xf32, #tpu.memory_space<vmem>>, vector<1x8x384xf32>
    %6 = vector.shape_cast %5 : vector<1x8x384xf32> to vector<8x384xf32>
    %c0_7 = arith.constant 0 : index
    %c0_8 = arith.constant 0 : index
    %c0_9 = arith.constant 0 : index
    %7 = vector.load %arg3[%c0_7, %c0_8, %c0_9] : memref<8x8x1xf32, #tpu.memory_space<vmem>>, vector<1x8x1xf32>
    %8 = vector.shape_cast %7 : vector<1x8x1xf32> to vector<8x1xf32>
    %cst = arith.constant dense<0.000000e+00> : vector<8x384xf32>
    %9 = tpu.matmul %4, %3, %cst {dimension_numbers = #tpu.dot_dimension_numbers<[1], [0], [0], [1], [0, 0, 1, 1], [], []>} : vector<8x128xf32>, vector<128x384xf32>, vector<8x384xf32> -> vector<8x384xf32>
    %10 = vector.extract_strided_slice %6 {offsets = [0, 0], sizes = [8, 128], strides = [1, 1]} : vector<8x384xf32> to vector<8x128xf32>
    %11 = vector.extract_strided_slice %9 {offsets = [0, 0], sizes = [8, 128], strides = [1, 1]} : vector<8x384xf32> to vector<8x128xf32>
    %12 = arith.addf %10, %11 : vector<8x128xf32>
    %13 = arith.negf %12 : vector<8x128xf32>
    %14 = math.exp %13 : vector<8x128xf32>
    %cst_10 = arith.constant 1.000000e+00 : f32
    %15 = vector.broadcast %cst_10 : f32 to vector<8x128xf32>
    %16 = arith.addf %15, %14 : vector<8x128xf32>
    %17 = arith.divf %15, %16 : vector<8x128xf32>
    %18 = vector.extract_strided_slice %6 {offsets = [0, 128], sizes = [8, 128], strides = [1, 1]} : vector<8x384xf32> to vector<8x128xf32>
    %19 = vector.extract_strided_slice %9 {offsets = [0, 128], sizes = [8, 128], strides = [1, 1]} : vector<8x384xf32> to vector<8x128xf32>
    %20 = arith.addf %18, %19 : vector<8x128xf32>
    %21 = arith.negf %20 : vector<8x128xf32>
    %22 = math.exp %21 : vector<8x128xf32>
    %cst_11 = arith.constant 1.000000e+00 : f32
    %23 = vector.broadcast %cst_11 : f32 to vector<8x128xf32>
    %24 = arith.addf %23, %22 : vector<8x128xf32>
    %25 = arith.divf %23, %24 : vector<8x128xf32>
    %26 = vector.extract_strided_slice %6 {offsets = [0, 256], sizes = [8, 128], strides = [1, 1]} : vector<8x384xf32> to vector<8x128xf32>
    %27 = vector.extract_strided_slice %9 {offsets = [0, 256], sizes = [8, 128], strides = [1, 1]} : vector<8x384xf32> to vector<8x128xf32>
    %28 = arith.mulf %17, %27 : vector<8x128xf32>
    %29 = arith.addf %26, %28 : vector<8x128xf32>
    %30 = math.tanh %29 : vector<8x128xf32>
    %cst_12 = arith.constant 1.000000e+00 : f32
    %31 = vector.broadcast %cst_12 : f32 to vector<8x128xf32>
    %32 = arith.subf %31, %25 : vector<8x128xf32>
    %33 = arith.mulf %32, %30 : vector<8x128xf32>
    %34 = arith.mulf %25, %4 : vector<8x128xf32>
    %35 = arith.addf %33, %34 : vector<8x128xf32>
    %36 = vector.broadcast %8 : vector<8x1xf32> to vector<8x128xf32>
    %37 = arith.mulf %36, %35 : vector<8x128xf32>
    %cst_13 = arith.constant 1.000000e+00 : f32
    %38 = vector.broadcast %cst_13 : f32 to vector<8x1xf32>
    %39 = arith.subf %38, %8 : vector<8x1xf32>
    %40 = vector.broadcast %39 : vector<8x1xf32> to vector<8x128xf32>
    %41 = arith.mulf %40, %4 : vector<8x128xf32>
    %42 = arith.addf %37, %41 : vector<8x128xf32>
    %c0_14 = arith.constant 0 : index
    %c0_15 = arith.constant 0 : index
    %c0_16 = arith.constant 0 : index
    %43 = vector.load %arg5[%c0_14, %c0_15, %c0_16] : memref<8x8x128xf32, #tpu.memory_space<vmem>>, vector<1x8x128xf32>
    %44 = vector.shape_cast %43 : vector<1x8x128xf32> to vector<8x128xf32>
    %45 = vector.shape_cast %42 : vector<8x128xf32> to vector<1x8x128xf32>
    tpu.vector_store %arg5[%c0_14, %c0_15, %c0_16], %45 {strides = array<i32>} : memref<8x8x128xf32, #tpu.memory_space<vmem>>, vector<1x8x128xf32>,
    %c1 = arith.constant 1 : index
    %c0_17 = arith.constant 0 : index
    %c0_18 = arith.constant 0 : index
    %46 = vector.load %arg2[%c1, %c0_17, %c0_18] : memref<8x8x384xf32, #tpu.memory_space<vmem>>, vector<1x8x384xf32>
    %47 = vector.shape_cast %46 : vector<1x8x384xf32> to vector<8x384xf32>
    %c1_19 = arith.constant 1 : index
    %c0_20 = arith.constant 0 : index
    %c0_21 = arith.constant 0 : index
    %48 = vector.load %arg3[%c1_19, %c0_20, %c0_21] : memref<8x8x1xf32, #tpu.memory_space<vmem>>, vector<1x8x1xf32>
    %49 = vector.shape_cast %48 : vector<1x8x1xf32> to vector<8x1xf32>
    %cst_22 = arith.constant dense<0.000000e+00> : vector<8x384xf32>
    %50 = tpu.matmul %42, %3, %cst_22 {dimension_numbers = #tpu.dot_dimension_numbers<[1], [0], [0], [1], [0, 0, 1, 1], [], []>} : vector<8x128xf32>, vector<128x384xf32>, vector<8x384xf32> -> vector<8x384xf32>
    %51 = vector.extract_strided_slice %47 {offsets = [0, 0], sizes = [8, 128], strides = [1, 1]} : vector<8x384xf32> to vector<8x128xf32>
    %52 = vector.extract_strided_slice %50 {offsets = [0, 0], sizes = [8, 128], strides = [1, 1]} : vector<8x384xf32> to vector<8x128xf32>
    %53 = arith.addf %51, %52 : vector<8x128xf32>
    %54 = arith.negf %53 : vector<8x128xf32>
    %55 = math.exp %54 : vector<8x128xf32>
    %cst_23 = arith.constant 1.000000e+00 : f32
    %56 = vector.broadcast %cst_23 : f32 to vector<8x128xf32>
    %57 = arith.addf %56, %55 : vector<8x128xf32>
    %58 = arith.divf %56, %57 : vector<8x128xf32>
    %59 = vector.extract_strided_slice %47 {offsets = [0, 128], sizes = [8, 128], strides = [1, 1]} : vector<8x384xf32> to vector<8x128xf32>
    %60 = vector.extract_strided_slice %50 {offsets = [0, 128], sizes = [8, 128], strides = [1, 1]} : vector<8x384xf32> to vector<8x128xf32>
    %61 = arith.addf %59, %60 : vector<8x128xf32>
    %62 = arith.negf %61 : vector<8x128xf32>
    %63 = math.exp %62 : vector<8x128xf32>
    %cst_24 = arith.constant 1.000000e+00 : f32
    %64 = vector.broadcast %cst_24 : f32 to vector<8x128xf32>
    %65 = arith.addf %64, %63 : vector<8x128xf32>
    %66 = arith.divf %64, %65 : vector<8x128xf32>
    %67 = vector.extract_strided_slice %47 {offsets = [0, 256], sizes = [8, 128], strides = [1, 1]} : vector<8x384xf32> to vector<8x128xf32>
    %68 = vector.extract_strided_slice %50 {offsets = [0, 256], sizes = [8, 128], strides = [1, 1]} : vector<8x384xf32> to vector<8x128xf32>
    %69 = arith.mulf %58, %68 : vector<8x128xf32>
    %70 = arith.addf %67, %69 : vector<8x128xf32>
    %71 = math.tanh %70 : vector<8x128xf32>
    %cst_25 = arith.constant 1.000000e+00 : f32
    %72 = vector.broadcast %cst_25 : f32 to vector<8x128xf32>
    %73 = arith.subf %72, %66 : vector<8x128xf32>
    %74 = arith.mulf %73, %71 : vector<8x128xf32>
    %75 = arith.mulf %66, %42 : vector<8x128xf32>
    %76 = arith.addf %74, %75 : vector<8x128xf32>
    %77 = vector.broadcast %49 : vector<8x1xf32> to vector<8x128xf32>
    %78 = arith.mulf %77, %76 : vector<8x128xf32>
    %cst_26 = arith.constant 1.000000e+00 : f32
    %79 = vector.broadcast %cst_26 : f32 to vector<8x1xf32>
    %80 = arith.subf %79, %49 : vector<8x1xf32>
    %81 = vector.broadcast %80 : vector<8x1xf32> to vector<8x128xf32>
    %82 = arith.mulf %81, %42 : vector<8x128xf32>
    %83 = arith.addf %78, %82 : vector<8x128xf32>
    %c1_27 = arith.constant 1 : index
    %c0_28 = arith.constant 0 : index
    %c0_29 = arith.constant 0 : index
    %84 = vector.load %arg5[%c1_27, %c0_28, %c0_29] : memref<8x8x128xf32, #tpu.memory_space<vmem>>, vector<1x8x128xf32>
    %85 = vector.shape_cast %84 : vector<1x8x128xf32> to vector<8x128xf32>
    %86 = vector.shape_cast %83 : vector<8x128xf32> to vector<1x8x128xf32>
    tpu.vector_store %arg5[%c1_27, %c0_28, %c0_29], %86 {strides = array<i32>} : memref<8x8x128xf32, #tpu.memory_space<vmem>>, vector<1x8x128xf32>,
    %c2 = arith.constant 2 : index
    %c0_30 = arith.constant 0 : index
    %c0_31 = arith.constant 0 : index
    %87 = vector.load %arg2[%c2, %c0_30, %c0_31] : memref<8x8x384xf32, #tpu.memory_space<vmem>>, vector<1x8x384xf32>
    %88 = vector.shape_cast %87 : vector<1x8x384xf32> to vector<8x384xf32>
    %c2_32 = arith.constant 2 : index
    %c0_33 = arith.constant 0 : index
    %c0_34 = arith.constant 0 : index
    %89 = vector.load %arg3[%c2_32, %c0_33, %c0_34] : memref<8x8x1xf32, #tpu.memory_space<vmem>>, vector<1x8x1xf32>
    %90 = vector.shape_cast %89 : vector<1x8x1xf32> to vector<8x1xf32>
    %cst_35 = arith.constant dense<0.000000e+00> : vector<8x384xf32>
    %91 = tpu.matmul %83, %3, %cst_35 {dimension_numbers = #tpu.dot_dimension_numbers<[1], [0], [0], [1], [0, 0, 1, 1], [], []>} : vector<8x128xf32>, vector<128x384xf32>, vector<8x384xf32> -> vector<8x384xf32>
    %92 = vector.extract_strided_slice %88 {offsets = [0, 0], sizes = [8, 128], strides = [1, 1]} : vector<8x384xf32> to vector<8x128xf32>
    %93 = vector.extract_strided_slice %91 {offsets = [0, 0], sizes = [8, 128], strides = [1, 1]} : vector<8x384xf32> to vector<8x128xf32>
    %94 = arith.addf %92, %93 : vector<8x128xf32>
    %95 = arith.negf %94 : vector<8x128xf32>
    %96 = math.exp %95 : vector<8x128xf32>
    %cst_36 = arith.constant 1.000000e+00 : f32
    %97 = vector.broadcast %cst_36 : f32 to vector<8x128xf32>
    %98 = arith.addf %97, %96 : vector<8x128xf32>
    %99 = arith.divf %97, %98 : vector<8x128xf32>
    %100 = vector.extract_strided_slice %88 {offsets = [0, 128], sizes = [8, 128], strides = [1, 1]} : vector<8x384xf32> to vector<8x128xf32>
    %101 = vector.extract_strided_slice %91 {offsets = [0, 128], sizes = [8, 128], strides = [1, 1]} : vector<8x384xf32> to vector<8x128xf32>
    %102 = arith.addf %100, %101 : vector<8x128xf32>
    %103 = arith.negf %102 : vector<8x128xf32>
    %104 = math.exp %103 : vector<8x128xf32>
    %cst_37 = arith.constant 1.000000e+00 : f32
    %105 = vector.broadcast %cst_37 : f32 to vector<8x128xf32>
    %106 = arith.addf %105, %104 : vector<8x128xf32>
    %107 = arith.divf %105, %106 : vector<8x128xf32>
    %108 = vector.extract_strided_slice %88 {offsets = [0, 256], sizes = [8, 128], strides = [1, 1]} : vector<8x384xf32> to vector<8x128xf32>
    %109 = vector.extract_strided_slice %91 {offsets = [0, 256], sizes = [8, 128], strides = [1, 1]} : vector<8x384xf32> to vector<8x128xf32>
    %110 = arith.mulf %99, %109 : vector<8x128xf32>
    %111 = arith.addf %108, %110 : vector<8x128xf32>
    %112 = math.tanh %111 : vector<8x128xf32>
    %cst_38 = arith.constant 1.000000e+00 : f32
    %113 = vector.broadcast %cst_38 : f32 to vector<8x128xf32>
    %114 = arith.subf %113, %107 : vector<8x128xf32>
    %115 = arith.mulf %114, %112 : vector<8x128xf32>
    %116 = arith.mulf %107, %83 : vector<8x128xf32>
    %117 = arith.addf %115, %116 : vector<8x128xf32>
    %118 = vector.broadcast %90 : vector<8x1xf32> to vector<8x128xf32>
    %119 = arith.mulf %118, %117 : vector<8x128xf32>
    %cst_39 = arith.constant 1.000000e+00 : f32
    %120 = vector.broadcast %cst_39 : f32 to vector<8x1xf32>
    %121 = arith.subf %120, %90 : vector<8x1xf32>
    %122 = vector.broadcast %121 : vector<8x1xf32> to vector<8x128xf32>
    %123 = arith.mulf %122, %83 : vector<8x128xf32>
    %124 = arith.addf %119, %123 : vector<8x128xf32>
    %c2_40 = arith.constant 2 : index
    %c0_41 = arith.constant 0 : index
    %c0_42 = arith.constant 0 : index
    %125 = vector.load %arg5[%c2_40, %c0_41, %c0_42] : memref<8x8x128xf32, #tpu.memory_space<vmem>>, vector<1x8x128xf32>
    %126 = vector.shape_cast %125 : vector<1x8x128xf32> to vector<8x128xf32>
    %127 = vector.shape_cast %124 : vector<8x128xf32> to vector<1x8x128xf32>
    tpu.vector_store %arg5[%c2_40, %c0_41, %c0_42], %127 {strides = array<i32>} : memref<8x8x128xf32, #tpu.memory_space<vmem>>, vector<1x8x128xf32>,
    %c3 = arith.constant 3 : index
    %c0_43 = arith.constant 0 : index
    %c0_44 = arith.constant 0 : index
    %128 = vector.load %arg2[%c3, %c0_43, %c0_44] : memref<8x8x384xf32, #tpu.memory_space<vmem>>, vector<1x8x384xf32>
    %129 = vector.shape_cast %128 : vector<1x8x384xf32> to vector<8x384xf32>
    %c3_45 = arith.constant 3 : index
    %c0_46 = arith.constant 0 : index
    %c0_47 = arith.constant 0 : index
    %130 = vector.load %arg3[%c3_45, %c0_46, %c0_47] : memref<8x8x1xf32, #tpu.memory_space<vmem>>, vector<1x8x1xf32>
    %131 = vector.shape_cast %130 : vector<1x8x1xf32> to vector<8x1xf32>
    %cst_48 = arith.constant dense<0.000000e+00> : vector<8x384xf32>
    %132 = tpu.matmul %124, %3, %cst_48 {dimension_numbers = #tpu.dot_dimension_numbers<[1], [0], [0], [1], [0, 0, 1, 1], [], []>} : vector<8x128xf32>, vector<128x384xf32>, vector<8x384xf32> -> vector<8x384xf32>
    %133 = vector.extract_strided_slice %129 {offsets = [0, 0], sizes = [8, 128], strides = [1, 1]} : vector<8x384xf32> to vector<8x128xf32>
    %134 = vector.extract_strided_slice %132 {offsets = [0, 0], sizes = [8, 128], strides = [1, 1]} : vector<8x384xf32> to vector<8x128xf32>
    %135 = arith.addf %133, %134 : vector<8x128xf32>
    %136 = arith.negf %135 : vector<8x128xf32>
    %137 = math.exp %136 : vector<8x128xf32>
    %cst_49 = arith.constant 1.000000e+00 : f32
    %138 = vector.broadcast %cst_49 : f32 to vector<8x128xf32>
    %139 = arith.addf %138, %137 : vector<8x128xf32>
    %140 = arith.divf %138, %139 : vector<8x128xf32>
    %141 = vector.extract_strided_slice %129 {offsets = [0, 128], sizes = [8, 128], strides = [1, 1]} : vector<8x384xf32> to vector<8x128xf32>
    %142 = vector.extract_strided_slice %132 {offsets = [0, 128], sizes = [8, 128], strides = [1, 1]} : vector<8x384xf32> to vector<8x128xf32>
    %143 = arith.addf %141, %142 : vector<8x128xf32>
    %144 = arith.negf %143 : vector<8x128xf32>
    %145 = math.exp %144 : vector<8x128xf32>
    %cst_50 = arith.constant 1.000000e+00 : f32
    %146 = vector.broadcast %cst_50 : f32 to vector<8x128xf32>
    %147 = arith.addf %146, %145 : vector<8x128xf32>
    %148 = arith.divf %146, %147 : vector<8x128xf32>
    %149 = vector.extract_strided_slice %129 {offsets = [0, 256], sizes = [8, 128], strides = [1, 1]} : vector<8x384xf32> to vector<8x128xf32>
    %150 = vector.extract_strided_slice %132 {offsets = [0, 256], sizes = [8, 128], strides = [1, 1]} : vector<8x384xf32> to vector<8x128xf32>
    %151 = arith.mulf %140, %150 : vector<8x128xf32>
    %152 = arith.addf %149, %151 : vector<8x128xf32>
    %153 = math.tanh %152 : vector<8x128xf32>
    %cst_51 = arith.constant 1.000000e+00 : f32
    %154 = vector.broadcast %cst_51 : f32 to vector<8x128xf32>
    %155 = arith.subf %154, %148 : vector<8x128xf32>
    %156 = arith.mulf %155, %153 : vector<8x128xf32>
    %157 = arith.mulf %148, %124 : vector<8x128xf32>
    %158 = arith.addf %156, %157 : vector<8x128xf32>
    %159 = vector.broadcast %131 : vector<8x1xf32> to vector<8x128xf32>
    %160 = arith.mulf %159, %158 : vector<8x128xf32>
    %cst_52 = arith.constant 1.000000e+00 : f32
    %161 = vector.broadcast %cst_52 : f32 to vector<8x1xf32>
    %162 = arith.subf %161, %131 : vector<8x1xf32>
    %163 = vector.broadcast %162 : vector<8x1xf32> to vector<8x128xf32>
    %164 = arith.mulf %163, %124 : vector<8x128xf32>
    %165 = arith.addf %160, %164 : vector<8x128xf32>
    %c3_53 = arith.constant 3 : index
    %c0_54 = arith.constant 0 : index
    %c0_55 = arith.constant 0 : index
    %166 = vector.load %arg5[%c3_53, %c0_54, %c0_55] : memref<8x8x128xf32, #tpu.memory_space<vmem>>, vector<1x8x128xf32>
    %167 = vector.shape_cast %166 : vector<1x8x128xf32> to vector<8x128xf32>
    %168 = vector.shape_cast %165 : vector<8x128xf32> to vector<1x8x128xf32>
    tpu.vector_store %arg5[%c3_53, %c0_54, %c0_55], %168 {strides = array<i32>} : memref<8x8x128xf32, #tpu.memory_space<vmem>>, vector<1x8x128xf32>,
    %c4 = arith.constant 4 : index
    %c0_56 = arith.constant 0 : index
    %c0_57 = arith.constant 0 : index
    %169 = vector.load %arg2[%c4, %c0_56, %c0_57] : memref<8x8x384xf32, #tpu.memory_space<vmem>>, vector<1x8x384xf32>
    %170 = vector.shape_cast %169 : vector<1x8x384xf32> to vector<8x384xf32>
    %c4_58 = arith.constant 4 : index
    %c0_59 = arith.constant 0 : index
    %c0_60 = arith.constant 0 : index
    %171 = vector.load %arg3[%c4_58, %c0_59, %c0_60] : memref<8x8x1xf32, #tpu.memory_space<vmem>>, vector<1x8x1xf32>
    %172 = vector.shape_cast %171 : vector<1x8x1xf32> to vector<8x1xf32>
    %cst_61 = arith.constant dense<0.000000e+00> : vector<8x384xf32>
    %173 = tpu.matmul %165, %3, %cst_61 {dimension_numbers = #tpu.dot_dimension_numbers<[1], [0], [0], [1], [0, 0, 1, 1], [], []>} : vector<8x128xf32>, vector<128x384xf32>, vector<8x384xf32> -> vector<8x384xf32>
    %174 = vector.extract_strided_slice %170 {offsets = [0, 0], sizes = [8, 128], strides = [1, 1]} : vector<8x384xf32> to vector<8x128xf32>
    %175 = vector.extract_strided_slice %173 {offsets = [0, 0], sizes = [8, 128], strides = [1, 1]} : vector<8x384xf32> to vector<8x128xf32>
    %176 = arith.addf %174, %175 : vector<8x128xf32>
    %177 = arith.negf %176 : vector<8x128xf32>
    %178 = math.exp %177 : vector<8x128xf32>
    %cst_62 = arith.constant 1.000000e+00 : f32
    %179 = vector.broadcast %cst_62 : f32 to vector<8x128xf32>
    %180 = arith.addf %179, %178 : vector<8x128xf32>
    %181 = arith.divf %179, %180 : vector<8x128xf32>
    %182 = vector.extract_strided_slice %170 {offsets = [0, 128], sizes = [8, 128], strides = [1, 1]} : vector<8x384xf32> to vector<8x128xf32>
    %183 = vector.extract_strided_slice %173 {offsets = [0, 128], sizes = [8, 128], strides = [1, 1]} : vector<8x384xf32> to vector<8x128xf32>
    %184 = arith.addf %182, %183 : vector<8x128xf32>
    %185 = arith.negf %184 : vector<8x128xf32>
    %186 = math.exp %185 : vector<8x128xf32>
    %cst_63 = arith.constant 1.000000e+00 : f32
    %187 = vector.broadcast %cst_63 : f32 to vector<8x128xf32>
    %188 = arith.addf %187, %186 : vector<8x128xf32>
    %189 = arith.divf %187, %188 : vector<8x128xf32>
    %190 = vector.extract_strided_slice %170 {offsets = [0, 256], sizes = [8, 128], strides = [1, 1]} : vector<8x384xf32> to vector<8x128xf32>
    %191 = vector.extract_strided_slice %173 {offsets = [0, 256], sizes = [8, 128], strides = [1, 1]} : vector<8x384xf32> to vector<8x128xf32>
    %192 = arith.mulf %181, %191 : vector<8x128xf32>
    %193 = arith.addf %190, %192 : vector<8x128xf32>
    %194 = math.tanh %193 : vector<8x128xf32>
    %cst_64 = arith.constant 1.000000e+00 : f32
    %195 = vector.broadcast %cst_64 : f32 to vector<8x128xf32>
    %196 = arith.subf %195, %189 : vector<8x128xf32>
    %197 = arith.mulf %196, %194 : vector<8x128xf32>
    %198 = arith.mulf %189, %165 : vector<8x128xf32>
    %199 = arith.addf %197, %198 : vector<8x128xf32>
    %200 = vector.broadcast %172 : vector<8x1xf32> to vector<8x128xf32>
    %201 = arith.mulf %200, %199 : vector<8x128xf32>
    %cst_65 = arith.constant 1.000000e+00 : f32
    %202 = vector.broadcast %cst_65 : f32 to vector<8x1xf32>
    %203 = arith.subf %202, %172 : vector<8x1xf32>
    %204 = vector.broadcast %203 : vector<8x1xf32> to vector<8x128xf32>
    %205 = arith.mulf %204, %165 : vector<8x128xf32>
    %206 = arith.addf %201, %205 : vector<8x128xf32>
    %c4_66 = arith.constant 4 : index
    %c0_67 = arith.constant 0 : index
    %c0_68 = arith.constant 0 : index
    %207 = vector.load %arg5[%c4_66, %c0_67, %c0_68] : memref<8x8x128xf32, #tpu.memory_space<vmem>>, vector<1x8x128xf32>
    %208 = vector.shape_cast %207 : vector<1x8x128xf32> to vector<8x128xf32>
    %209 = vector.shape_cast %206 : vector<8x128xf32> to vector<1x8x128xf32>
    tpu.vector_store %arg5[%c4_66, %c0_67, %c0_68], %209 {strides = array<i32>} : memref<8x8x128xf32, #tpu.memory_space<vmem>>, vector<1x8x128xf32>,
    %c5 = arith.constant 5 : index
    %c0_69 = arith.constant 0 : index
    %c0_70 = arith.constant 0 : index
    %210 = vector.load %arg2[%c5, %c0_69, %c0_70] : memref<8x8x384xf32, #tpu.memory_space<vmem>>, vector<1x8x384xf32>
    %211 = vector.shape_cast %210 : vector<1x8x384xf32> to vector<8x384xf32>
    %c5_71 = arith.constant 5 : index
    %c0_72 = arith.constant 0 : index
    %c0_73 = arith.constant 0 : index
    %212 = vector.load %arg3[%c5_71, %c0_72, %c0_73] : memref<8x8x1xf32, #tpu.memory_space<vmem>>, vector<1x8x1xf32>
    %213 = vector.shape_cast %212 : vector<1x8x1xf32> to vector<8x1xf32>
    %cst_74 = arith.constant dense<0.000000e+00> : vector<8x384xf32>
    %214 = tpu.matmul %206, %3, %cst_74 {dimension_numbers = #tpu.dot_dimension_numbers<[1], [0], [0], [1], [0, 0, 1, 1], [], []>} : vector<8x128xf32>, vector<128x384xf32>, vector<8x384xf32> -> vector<8x384xf32>
    %215 = vector.extract_strided_slice %211 {offsets = [0, 0], sizes = [8, 128], strides = [1, 1]} : vector<8x384xf32> to vector<8x128xf32>
    %216 = vector.extract_strided_slice %214 {offsets = [0, 0], sizes = [8, 128], strides = [1, 1]} : vector<8x384xf32> to vector<8x128xf32>
    %217 = arith.addf %215, %216 : vector<8x128xf32>
    %218 = arith.negf %217 : vector<8x128xf32>
    %219 = math.exp %218 : vector<8x128xf32>
    %cst_75 = arith.constant 1.000000e+00 : f32
    %220 = vector.broadcast %cst_75 : f32 to vector<8x128xf32>
    %221 = arith.addf %220, %219 : vector<8x128xf32>
    %222 = arith.divf %220, %221 : vector<8x128xf32>
    %223 = vector.extract_strided_slice %211 {offsets = [0, 128], sizes = [8, 128], strides = [1, 1]} : vector<8x384xf32> to vector<8x128xf32>
    %224 = vector.extract_strided_slice %214 {offsets = [0, 128], sizes = [8, 128], strides = [1, 1]} : vector<8x384xf32> to vector<8x128xf32>
    %225 = arith.addf %223, %224 : vector<8x128xf32>
    %226 = arith.negf %225 : vector<8x128xf32>
    %227 = math.exp %226 : vector<8x128xf32>
    %cst_76 = arith.constant 1.000000e+00 : f32
    %228 = vector.broadcast %cst_76 : f32 to vector<8x128xf32>
    %229 = arith.addf %228, %227 : vector<8x128xf32>
    %230 = arith.divf %228, %229 : vector<8x128xf32>
    %231 = vector.extract_strided_slice %211 {offsets = [0, 256], sizes = [8, 128], strides = [1, 1]} : vector<8x384xf32> to vector<8x128xf32>
    %232 = vector.extract_strided_slice %214 {offsets = [0, 256], sizes = [8, 128], strides = [1, 1]} : vector<8x384xf32> to vector<8x128xf32>
    %233 = arith.mulf %222, %232 : vector<8x128xf32>
    %234 = arith.addf %231, %233 : vector<8x128xf32>
    %235 = math.tanh %234 : vector<8x128xf32>
    %cst_77 = arith.constant 1.000000e+00 : f32
    %236 = vector.broadcast %cst_77 : f32 to vector<8x128xf32>
    %237 = arith.subf %236, %230 : vector<8x128xf32>
    %238 = arith.mulf %237, %235 : vector<8x128xf32>
    %239 = arith.mulf %230, %206 : vector<8x128xf32>
    %240 = arith.addf %238, %239 : vector<8x128xf32>
    %241 = vector.broadcast %213 : vector<8x1xf32> to vector<8x128xf32>
    %242 = arith.mulf %241, %240 : vector<8x128xf32>
    %cst_78 = arith.constant 1.000000e+00 : f32
    %243 = vector.broadcast %cst_78 : f32 to vector<8x1xf32>
    %244 = arith.subf %243, %213 : vector<8x1xf32>
    %245 = vector.broadcast %244 : vector<8x1xf32> to vector<8x128xf32>
    %246 = arith.mulf %245, %206 : vector<8x128xf32>
    %247 = arith.addf %242, %246 : vector<8x128xf32>
    %c5_79 = arith.constant 5 : index
    %c0_80 = arith.constant 0 : index
    %c0_81 = arith.constant 0 : index
    %248 = vector.load %arg5[%c5_79, %c0_80, %c0_81] : memref<8x8x128xf32, #tpu.memory_space<vmem>>, vector<1x8x128xf32>
    %249 = vector.shape_cast %248 : vector<1x8x128xf32> to vector<8x128xf32>
    %250 = vector.shape_cast %247 : vector<8x128xf32> to vector<1x8x128xf32>
    tpu.vector_store %arg5[%c5_79, %c0_80, %c0_81], %250 {strides = array<i32>} : memref<8x8x128xf32, #tpu.memory_space<vmem>>, vector<1x8x128xf32>,
    %c6 = arith.constant 6 : index
    %c0_82 = arith.constant 0 : index
    %c0_83 = arith.constant 0 : index
    %251 = vector.load %arg2[%c6, %c0_82, %c0_83] : memref<8x8x384xf32, #tpu.memory_space<vmem>>, vector<1x8x384xf32>
    %252 = vector.shape_cast %251 : vector<1x8x384xf32> to vector<8x384xf32>
    %c6_84 = arith.constant 6 : index
    %c0_85 = arith.constant 0 : index
    %c0_86 = arith.constant 0 : index
    %253 = vector.load %arg3[%c6_84, %c0_85, %c0_86] : memref<8x8x1xf32, #tpu.memory_space<vmem>>, vector<1x8x1xf32>
    %254 = vector.shape_cast %253 : vector<1x8x1xf32> to vector<8x1xf32>
    %cst_87 = arith.constant dense<0.000000e+00> : vector<8x384xf32>
    %255 = tpu.matmul %247, %3, %cst_87 {dimension_numbers = #tpu.dot_dimension_numbers<[1], [0], [0], [1], [0, 0, 1, 1], [], []>} : vector<8x128xf32>, vector<128x384xf32>, vector<8x384xf32> -> vector<8x384xf32>
    %256 = vector.extract_strided_slice %252 {offsets = [0, 0], sizes = [8, 128], strides = [1, 1]} : vector<8x384xf32> to vector<8x128xf32>
    %257 = vector.extract_strided_slice %255 {offsets = [0, 0], sizes = [8, 128], strides = [1, 1]} : vector<8x384xf32> to vector<8x128xf32>
    %258 = arith.addf %256, %257 : vector<8x128xf32>
    %259 = arith.negf %258 : vector<8x128xf32>
    %260 = math.exp %259 : vector<8x128xf32>
    %cst_88 = arith.constant 1.000000e+00 : f32
    %261 = vector.broadcast %cst_88 : f32 to vector<8x128xf32>
    %262 = arith.addf %261, %260 : vector<8x128xf32>
    %263 = arith.divf %261, %262 : vector<8x128xf32>
    %264 = vector.extract_strided_slice %252 {offsets = [0, 128], sizes = [8, 128], strides = [1, 1]} : vector<8x384xf32> to vector<8x128xf32>
    %265 = vector.extract_strided_slice %255 {offsets = [0, 128], sizes = [8, 128], strides = [1, 1]} : vector<8x384xf32> to vector<8x128xf32>
    %266 = arith.addf %264, %265 : vector<8x128xf32>
    %267 = arith.negf %266 : vector<8x128xf32>
    %268 = math.exp %267 : vector<8x128xf32>
    %cst_89 = arith.constant 1.000000e+00 : f32
    %269 = vector.broadcast %cst_89 : f32 to vector<8x128xf32>
    %270 = arith.addf %269, %268 : vector<8x128xf32>
    %271 = arith.divf %269, %270 : vector<8x128xf32>
    %272 = vector.extract_strided_slice %252 {offsets = [0, 256], sizes = [8, 128], strides = [1, 1]} : vector<8x384xf32> to vector<8x128xf32>
    %273 = vector.extract_strided_slice %255 {offsets = [0, 256], sizes = [8, 128], strides = [1, 1]} : vector<8x384xf32> to vector<8x128xf32>
    %274 = arith.mulf %263, %273 : vector<8x128xf32>
    %275 = arith.addf %272, %274 : vector<8x128xf32>
    %276 = math.tanh %275 : vector<8x128xf32>
    %cst_90 = arith.constant 1.000000e+00 : f32
    %277 = vector.broadcast %cst_90 : f32 to vector<8x128xf32>
    %278 = arith.subf %277, %271 : vector<8x128xf32>
    %279 = arith.mulf %278, %276 : vector<8x128xf32>
    %280 = arith.mulf %271, %247 : vector<8x128xf32>
    %281 = arith.addf %279, %280 : vector<8x128xf32>
    %282 = vector.broadcast %254 : vector<8x1xf32> to vector<8x128xf32>
    %283 = arith.mulf %282, %281 : vector<8x128xf32>
    %cst_91 = arith.constant 1.000000e+00 : f32
    %284 = vector.broadcast %cst_91 : f32 to vector<8x1xf32>
    %285 = arith.subf %284, %254 : vector<8x1xf32>
    %286 = vector.broadcast %285 : vector<8x1xf32> to vector<8x128xf32>
    %287 = arith.mulf %286, %247 : vector<8x128xf32>
    %288 = arith.addf %283, %287 : vector<8x128xf32>
    %c6_92 = arith.constant 6 : index
    %c0_93 = arith.constant 0 : index
    %c0_94 = arith.constant 0 : index
    %289 = vector.load %arg5[%c6_92, %c0_93, %c0_94] : memref<8x8x128xf32, #tpu.memory_space<vmem>>, vector<1x8x128xf32>
    %290 = vector.shape_cast %289 : vector<1x8x128xf32> to vector<8x128xf32>
    %291 = vector.shape_cast %288 : vector<8x128xf32> to vector<1x8x128xf32>
    tpu.vector_store %arg5[%c6_92, %c0_93, %c0_94], %291 {strides = array<i32>} : memref<8x8x128xf32, #tpu.memory_space<vmem>>, vector<1x8x128xf32>,
    %c7 = arith.constant 7 : index
    %c0_95 = arith.constant 0 : index
    %c0_96 = arith.constant 0 : index
    %292 = vector.load %arg2[%c7, %c0_95, %c0_96] : memref<8x8x384xf32, #tpu.memory_space<vmem>>, vector<1x8x384xf32>
    %293 = vector.shape_cast %292 : vector<1x8x384xf32> to vector<8x384xf32>
    %c7_97 = arith.constant 7 : index
    %c0_98 = arith.constant 0 : index
    %c0_99 = arith.constant 0 : index
    %294 = vector.load %arg3[%c7_97, %c0_98, %c0_99] : memref<8x8x1xf32, #tpu.memory_space<vmem>>, vector<1x8x1xf32>
    %295 = vector.shape_cast %294 : vector<1x8x1xf32> to vector<8x1xf32>
    %cst_100 = arith.constant dense<0.000000e+00> : vector<8x384xf32>
    %296 = tpu.matmul %288, %3, %cst_100 {dimension_numbers = #tpu.dot_dimension_numbers<[1], [0], [0], [1], [0, 0, 1, 1], [], []>} : vector<8x128xf32>, vector<128x384xf32>, vector<8x384xf32> -> vector<8x384xf32>
    %297 = vector.extract_strided_slice %293 {offsets = [0, 0], sizes = [8, 128], strides = [1, 1]} : vector<8x384xf32> to vector<8x128xf32>
    %298 = vector.extract_strided_slice %296 {offsets = [0, 0], sizes = [8, 128], strides = [1, 1]} : vector<8x384xf32> to vector<8x128xf32>
    %299 = arith.addf %297, %298 : vector<8x128xf32>
    %300 = arith.negf %299 : vector<8x128xf32>
    %301 = math.exp %300 : vector<8x128xf32>
    %cst_101 = arith.constant 1.000000e+00 : f32
    %302 = vector.broadcast %cst_101 : f32 to vector<8x128xf32>
    %303 = arith.addf %302, %301 : vector<8x128xf32>
    %304 = arith.divf %302, %303 : vector<8x128xf32>
    %305 = vector.extract_strided_slice %293 {offsets = [0, 128], sizes = [8, 128], strides = [1, 1]} : vector<8x384xf32> to vector<8x128xf32>
    %306 = vector.extract_strided_slice %296 {offsets = [0, 128], sizes = [8, 128], strides = [1, 1]} : vector<8x384xf32> to vector<8x128xf32>
    %307 = arith.addf %305, %306 : vector<8x128xf32>
    %308 = arith.negf %307 : vector<8x128xf32>
    %309 = math.exp %308 : vector<8x128xf32>
    %cst_102 = arith.constant 1.000000e+00 : f32
    %310 = vector.broadcast %cst_102 : f32 to vector<8x128xf32>
    %311 = arith.addf %310, %309 : vector<8x128xf32>
    %312 = arith.divf %310, %311 : vector<8x128xf32>
    %313 = vector.extract_strided_slice %293 {offsets = [0, 256], sizes = [8, 128], strides = [1, 1]} : vector<8x384xf32> to vector<8x128xf32>
    %314 = vector.extract_strided_slice %296 {offsets = [0, 256], sizes = [8, 128], strides = [1, 1]} : vector<8x384xf32> to vector<8x128xf32>
    %315 = arith.mulf %304, %314 : vector<8x128xf32>
    %316 = arith.addf %313, %315 : vector<8x128xf32>
    %317 = math.tanh %316 : vector<8x128xf32>
    %cst_103 = arith.constant 1.000000e+00 : f32
    %318 = vector.broadcast %cst_103 : f32 to vector<8x128xf32>
    %319 = arith.subf %318, %312 : vector<8x128xf32>
    %320 = arith.mulf %319, %317 : vector<8x128xf32>
    %321 = arith.mulf %312, %288 : vector<8x128xf32>
    %322 = arith.addf %320, %321 : vector<8x128xf32>
    %323 = vector.broadcast %295 : vector<8x1xf32> to vector<8x128xf32>
    %324 = arith.mulf %323, %322 : vector<8x128xf32>
    %cst_104 = arith.constant 1.000000e+00 : f32
    %325 = vector.broadcast %cst_104 : f32 to vector<8x1xf32>
    %326 = arith.subf %325, %295 : vector<8x1xf32>
    %327 = vector.broadcast %326 : vector<8x1xf32> to vector<8x128xf32>
    %328 = arith.mulf %327, %288 : vector<8x128xf32>
    %329 = arith.addf %324, %328 : vector<8x128xf32>
    %c7_105 = arith.constant 7 : index
    %c0_106 = arith.constant 0 : index
    %c0_107 = arith.constant 0 : index
    %330 = vector.load %arg5[%c7_105, %c0_106, %c0_107] : memref<8x8x128xf32, #tpu.memory_space<vmem>>, vector<1x8x128xf32>
    %331 = vector.shape_cast %330 : vector<1x8x128xf32> to vector<8x128xf32>
    %332 = vector.shape_cast %329 : vector<8x128xf32> to vector<1x8x128xf32>
    tpu.vector_store %arg5[%c7_105, %c0_106, %c0_107], %332 {strides = array<i32>} : memref<8x8x128xf32, #tpu.memory_space<vmem>>, vector<1x8x128xf32>,
    %c0_108 = arith.constant 0 : index
    %c0_109 = arith.constant 0 : index
    %333 = vector.load %arg7[%c0_108, %c0_109] : memref<8x128xf32, #tpu.memory_space<vmem>>, vector<8x128xf32>
    tpu.vector_store %arg7[%c0_108, %c0_109], %329 {strides = array<i32>} : memref<8x128xf32, #tpu.memory_space<vmem>>, vector<8x128xf32>,
    %c0_i32_110 = arith.constant 0 : i32
    %334 = arith.cmpi eq, %arg1, %c0_i32_110 : i32
    %335 = arith.extui %334 : i1 to i32
    %c0_i32_111 = arith.constant 0 : i32
    %336 = arith.cmpi ne, %335, %c0_i32_111 : i32
    scf.if %336 {
      %c0_112 = arith.constant 0 : index
      %c0_113 = arith.constant 0 : index
      %337 = vector.load %arg6[%c0_112, %c0_113] : memref<8x128xf32, #tpu.memory_space<vmem>>, vector<8x128xf32>
      tpu.vector_store %arg6[%c0_112, %c0_113], %329 {strides = array<i32>} : memref<8x128xf32, #tpu.memory_space<vmem>>, vector<8x128xf32>,
    } else {
    }
    return
  }
  func.func @transform_0(%arg0: i32, %arg1: i32) -> (i32, i32, i32) {
    %c0_i32 = arith.constant 0 : i32
    %c0_i32_0 = arith.constant 0 : i32
    return %arg1, %arg0, %c0_i32 : i32, i32, i32
  }
  func.func @transform_1(%arg0: i32, %arg1: i32) -> (i32, i32, i32) {
    %c0_i32 = arith.constant 0 : i32
    %c0_i32_0 = arith.constant 0 : i32
    return %arg1, %arg0, %c0_i32 : i32, i32, i32
  }
  func.func @transform_2(%arg0: i32, %arg1: i32) -> (i32, i32) {
    %c0_i32 = arith.constant 0 : i32
    %c0_i32_0 = arith.constant 0 : i32
    %c0_i32_1 = arith.constant 0 : i32
    return %c0_i32, %c0_i32_0 : i32, i32
  }
  func.func @transform_3(%arg0: i32, %arg1: i32) -> (i32, i32, i32) {
    %c0_i32 = arith.constant 0 : i32
    %c0_i32_0 = arith.constant 0 : i32
    return %arg1, %arg0, %c0_i32 : i32, i32, i32
  }
  func.func @transform_4(%arg0: i32, %arg1: i32) -> (i32, i32) {
    %c0_i32 = arith.constant 0 : i32
    %c0_i32_0 = arith.constant 0 : i32
    return %arg0, %c0_i32 : i32, i32
  }
}

</mosaic_0001>

<bundles_post_ra>
// kernel: tpu_custom_call.1
= control target key start
LH: loop header
LB: loop body
LE: loop exit
PB: predicated region body
PF: predicated region fallthrough
CT: control target
= control target key end

     0   :  { %10 = vsyncpa [#allocation4], 0  ;;  %s3171_s0 = inlined_call_operand.hbm [shape: f32[8,8,384], index: 0, kind: input, shape index: {}]   ;;  %s3172_s1 = inlined_call_operand.vmem [shape: f32[8,8,1], index: 1, kind: input, shape index: {}]   ;;  %s3173_s2 = inlined_call_operand.hbm [shape: f32[128,384], index: 2, kind: input, shape index: {}]   ;;  %s3174_s3 = inlined_call_operand.hbm [shape: f32[8,8,128], index: 3, kind: output, shape index: {0}]   ;;  %s3175_s4 = inlined_call_operand.hbm [shape: f32[8,128], index: 4, kind: output, shape index: {1}]  }
   0x1   :  { %11 = vsyncpa [#allocation7], 0 }
   0x2   :  { %12 = vsyncpa [#allocation5], 0 }
   0x3   :  { %13 = vsyncpa [#allocation10], 0  ;;  %s2683_s15 = smov [#allocation3]   ;;  %s2587_s19 = scalar_lea.hbm %s3171_s0, 3072 }
   0x4   :  { %s19_s16 = sshll.u32 %s2683_s15, 4  ;;  %p2588_p0 = scmp.ne.s32.totalorder %s3171_s0, %s2587_s19  ;;  %s20_s16 = int_to_ptr.vmem [resolvable:$true] %s19_s16 }
   0x5   :  { %p2591_p1 = scmp.lt.u32.totalorder %s2587_s19, %s3171_s0 }
   0x7   :  { %p2593_p2 = pnand %p2591_p1, %p2588_p0 }
   0x9   :  { %2596 = shalt.err (!%p2593_p2)
}
   0xa   :  { %s2597_s24 = scalar_lea.vmem %s20_s16, 3072  ;;  %p2602_p4 = scmp.lt.s32.totalorder %s20_s16, %s20_s16 }
   0xb   :  { %p2598_p3 = scmp.ne.s32.totalorder %s20_s16, %s2597_s24  ;;  %p2603_p5 = scmp.lt.s32.totalorder %s2597_s24, %s2597_s24 }
   0xd   :  { %p2604_p6 = por %p2603_p5, %p2602_p4 }
   0xf   :  { %p2605_p7 = pnand %p2604_p6, %p2598_p3 }
  0x11   :  { %2608 = shalt.err (!%p2605_p7)
}
  0x12   :  { %s2684_s25 = smov 384   ;;  %s2685_s26 = smov 24  }
  0x13   :  { %25 = dma.hbm_to_vmem [thread:$0]  %s3171_s0, 3072, %s20_s16, [#allocation4], %s2684_s25, %s2684_s25, %s2685_s26  }
  0x14   :  { %s2686_s29 = smov [#allocation6]   ;;  %s2609_s7 = scalar_lea.hbm %s3173_s2, 6144 }
  0x15   :  { %s33_s30 = sshll.u32 %s2686_s29, 4  ;;  %p2610_p8 = scmp.ne.s32.totalorder %s3173_s2, %s2609_s7  ;;  %s34_s30 = int_to_ptr.vmem [resolvable:$true] %s33_s30 }
  0x16   :  { %p2613_p9 = scmp.lt.u32.totalorder %s2609_s7, %s3173_s2 }
  0x18   :  { %p2615_p10 = pnand %p2613_p9, %p2610_p8 }
  0x1a   :  { %2618 = shalt.err (!%p2615_p10)
}
  0x1b   :  { %s2619_s12 = scalar_lea.vmem %s34_s30, 6144  ;;  %p2624_p12 = scmp.lt.s32.totalorder %s34_s30, %s34_s30 }
  0x1c   :  { %p2620_p11 = scmp.ne.s32.totalorder %s34_s30, %s2619_s12  ;;  %p2625_p13 = scmp.lt.s32.totalorder %s2619_s12, %s2619_s12 }
  0x1e   :  { %p2626_p0 = por %p2625_p13, %p2624_p12 }
  0x20   :  { %p2627_p1 = pnand %p2626_p0, %p2620_p11 }
  0x22   :  { %2630 = shalt.err (!%p2627_p1)
}
  0x23   :  { %39 = dma.hbm_to_vmem [thread:$0]  %s3173_s2, 6144, %s34_s30, [#allocation7], %s2684_s25, %s2684_s25, %s2685_s26  }
  0x24   :  { %2675 = dma.done.wait [#allocation4], 3072  }
  0x25   :  { %2676 = vsyncadd [#allocation4], 4294964224 }
  0x26   :  { %2677 = dma.done.wait [#allocation7], 6144  }
  0x27   :  { %2678 = vsyncadd [#allocation7], 4294961152  ;;  %v2687_v0 = vmov 0.0|0.0   ;;  %v2688_v1 = vmov 0.0   ;;  %vm2689_vm0 = vmmov 0   ;;  %v2690_v2 = vmov 0  }
  0x28   :  { %2077 = vmatprep.subr.bf16.mxu1 %v2687_v0  ;;  %168 = vmatprep.mubr.f32.mxu0 %v2688_v1  ;;  %v52_v3 = vld [vmem:[#allocation6 + $0x8] sm:$0xff]  ;;  %v55_v4 = vld [vmem:[#allocation6 + $0x20] sm:$0xff]  ;;  %v54_v7 = vld [vmem:[#allocation6 + $0x18] sm:$0xff]  ;;  %s2692_s30 = smov [#allocation9]  }
  0x29   :  { %1797 = vmatprep.mubr.msk.f32.mxu1 %vm2689_vm0, %v2688_v1  ;;  %2505 = vset.pattern.permute.xlu0 %v2690_v2  ;;  %v51_v5 = vld [vmem:[#allocation6] sm:$0xff]  ;;  %v2748_v6 = vpack.c.bf16 %v55_v4, %v52_v3  ;;  %v58_v8 = vld [vmem:[#allocation6 + $0x38] sm:$0xff]  ;;  %v61_v9 = vld [vmem:[#allocation6 + $0x50] sm:$0xff]  ;;  %s1592_s5 = sshll.u32 %s2692_s30, 4  ;;  %s3140_s5 = int_to_ptr.vmem [resolvable:$true] %s1592_s5 }
  0x2a   :  { %2506 = vset.pattern.permute.xlu1 %v2690_v2  ;;  %v2750_v10 = vpack.c.bf16 %v54_v7, %v51_v5  ;;  %v2752_v11 = vpack.c.bf16 %v61_v9, %v58_v8  ;;  %v57_v12 = vld [vmem:[#allocation6 + $0x30] sm:$0xff]  ;;  %v60_v13 = vld [vmem:[#allocation6 + $0x48] sm:$0xff]  ;;  %v67_v15 = vld [vmem:[#allocation6 + $0x80] sm:$0xff] }
  0x2b   :  { %v64_v14 = vld [vmem:[#allocation6 + $0x68] sm:$0xff]  ;;  %2046 = vmatprep.subr.bf16.mxu0 %v2748_v6  ;;  %v2756_v16 = vpack.c.bf16 %v60_v13, %v57_v12  ;;  %v63_v18 = vld [vmem:[#allocation6 + $0x60] sm:$0xff]  ;;  %v66_v19 = vld [vmem:[#allocation6 + $0x78] sm:$0xff] }
  0x2c   :  { %2048 = vmatpush1.bf16.msra.mxu0 %v2750_v10  ;;  %v2759_v17 = vpack.c.bf16 %v67_v15, %v64_v14  ;;  %v70_v20 = vld [vmem:[#allocation6 + $0x98] sm:$0xff]  ;;  %v73_v21 = vld [vmem:[#allocation6 + $0xb0] sm:$0xff]  ;;  %v2762_v22 = vpack.c.bf16 %v66_v19, %v63_v18  ;;  %v72_v25 = vld [vmem:[#allocation6 + $0xa8] sm:$0xff] }
  0x2d   :  { %2050 = vmatprep.subr.bf16.mxu0 %v2752_v11  ;;  %v2765_v23 = vpack.c.bf16 %v73_v21, %v70_v20  ;;  %v69_v24 = vld [vmem:[#allocation6 + $0x90] sm:$0xff]  ;;  %v76_v26 = vld [vmem:[#allocation6 + $0xc8] sm:$0xff]  ;;  %v79_v27 = vld [vmem:[#allocation6 + $0xe0] sm:$0xff] }
  0x2e   :  { %v53_v28 = vld [vmem:[#allocation6 + $0x10] sm:$0xff]  ;;  %v56_v29 = vld [vmem:[#allocation6 + $0x28] sm:$0xff]  ;;  %v59_v31 = vld [vmem:[#allocation6 + $0x40] sm:$0xff]  ;;  %v2770_v33 = vpack.c.bf16 %v72_v25, %v69_v24  ;;  %v2773_v34 = vpack.c.bf16 %v79_v27, %v76_v26 }
  0x2f   :  { %v2767_v30 = vpack.c.bf16 %v56_v29, %v53_v28  ;;  %v62_v32 = vld [vmem:[#allocation6 + $0x58] sm:$0xff]  ;;  %v75_v35 = vld [vmem:[#allocation6 + $0xc0] sm:$0xff]  ;;  %v85_v39 = vld [vmem:[#allocation6 + $0x110] sm:$0xff] }
  0x30   :  { %2052 = vmatpush1.bf16.msra.mxu0 %v2756_v16  ;;  %v78_v36 = vld [vmem:[#allocation6 + $0xd8] sm:$0xff]  ;;  %v2776_v38 = vpack.c.bf16 %v62_v32, %v59_v31  ;;  %v65_v40 = vld [vmem:[#allocation6 + $0x70] sm:$0xff]  ;;  %v68_v41 = vld [vmem:[#allocation6 + $0x88] sm:$0xff] }
  0x31   :  { %2054 = vmatprep.subr.bf16.mxu0 %v2759_v17  ;;  %v82_v37 = vld [vmem:[#allocation6 + $0xf8] sm:$0xff]  ;;  %2079 = vmatpush3.bf16.msra.mxu1 %v2767_v30  ;;  %v2780_v42 = vpack.c.bf16 %v78_v36, %v75_v35  ;;  %v81_v43 = vld [vmem:[#allocation6 + $0xf0] sm:$0xff]  ;;  %v103_v44 = vld [vmem:[%s3172_s1] sm:$0xff]  ;;  %v2789_v49 = vpack.c.bf16 %v68_v41, %v65_v40 }
  0x32   :  { %2080 = vmatprep.subr.bf16.mxu1 %v2687_v0  ;;  %v2786_v45 = vpack.c.bf16 %v85_v39, %v82_v37  ;;  %v84_v46 = vld [vmem:[#allocation6 + $0x108] sm:$0xff]  ;;  %v91_v48 = vld [vmem:[#allocation6 + $0x140] sm:$0xff]  ;;  %v74_v51 = vld [vmem:[#allocation6 + $0xb8] sm:$0xff]  ;;  %268 = vperm.xlu0 %2505, %v103_v44   ;;  %v272_v52 = vsub.f32 1.0, %v103_v44 }
  0x33   :  { %v88_v47 = vld [vmem:[#allocation6 + $0x128] sm:$0xff]  ;;  %v71_v50 = vld [vmem:[#allocation6 + $0xa0] sm:$0xff]  ;;  %v2796_v55 = vpack.c.bf16 %v84_v46, %v81_v43  ;;  %v90_v58 = vld [vmem:[#allocation6 + $0x138] sm:$0xff] }
  0x34   :  { %2056 = vmatpush1.bf16.msra.mxu0 %v2762_v22  ;;  %v1608_v53 = vld [vmem:[%s3172_s1 + $0x8] sm:$0xff]  ;;  %v87_v56 = vld [vmem:[#allocation6 + $0x120] sm:$0xff]  ;;  %v2799_v57 = vpack.c.bf16 %v91_v48, %v88_v47  ;;  %v94_v59 = vld [vmem:[#allocation6 + $0x158] sm:$0xff]  ;;  %v2802_v61 = vpack.c.bf16 %v74_v51, %v71_v50 }
  0x35   :  { %2058 = vmatprep.subr.bf16.mxu0 %v2765_v23  ;;  %2082 = vmatpush3.bf16.msra.mxu1 %v2776_v38  ;;  %v455_v54 = vsub.f32 1.0, %v1608_v53  ;;  %v97_v60 = vld [vmem:[#allocation6 + $0x170] sm:$0xff]  ;;  %v80_v63 = vld [vmem:[#allocation6 + $0xe8] sm:$0xff]  ;;  %v2809_v4 = vpack.c.bf16 %v90_v58, %v87_v56  ;;  %v83_v12 = vld [vmem:[#allocation6 + $0x100] sm:$0xff] }
  0x36   :  { %2083 = vmatprep.subr.bf16.mxu1 %v2687_v0  ;;  %451 = vperm.xlu1 %2506, %v1608_v53   ;;  %v77_v62 = vld [vmem:[#allocation6 + $0xd0] sm:$0xff]  ;;  %v2812_v5 = vpack.c.bf16 %v97_v60, %v94_v59  ;;  %v96_v8 = vld [vmem:[#allocation6 + $0x168] sm:$0xff]  ;;  %v86_v13 = vld [vmem:[#allocation6 + $0x118] sm:$0xff] }
  0x37   :  { %275 = vperm.xlu0 %2505, %v272_v52   ;;  %v1611_v2 = vld [vmem:[%s3172_s1 + $0x10] sm:$0xff]  ;;  %v2815_v9 = vpack.c.bf16 %v80_v63, %v77_v62  ;;  %v1614_v14 = vld [vmem:[%s3172_s1 + $0x18] sm:$0xff]  ;;  %v2826_v19 = vpack.c.bf16 %v86_v13, %v83_v12  ;;  %v92_v21 = vld [vmem:[#allocation6 + $0x148] sm:$0xff] }
  0x38   :  { %2060 = vmatpush1.bf16.msra.mxu0 %v2770_v33  ;;  %v639_v3 = vsub.f32 1.0, %v1611_v2  ;;  %v93_v7 = vld [vmem:[#allocation6 + $0x150] sm:$0xff]  ;;  %v823_v15 = vsub.f32 1.0, %v1614_v14  ;;  %v1617_v24 = vld [vmem:[%s3172_s1 + $0x20] sm:$0xff]  ;;  %v98_v28 = vld [vmem:[#allocation6 + $0x178] sm:$0xff] }
  0x39   :  { %2062 = vmatprep.subr.bf16.mxu0 %v2773_v34  ;;  %2085 = vmatpush3.bf16.msra.mxu1 %v2789_v49  ;;  %v2822_v18 = vpack.c.bf16 %v96_v8, %v93_v7  ;;  %v89_v20 = vld [vmem:[#allocation6 + $0x130] sm:$0xff]  ;;  %v1007_v25 = vsub.f32 1.0, %v1617_v24  ;;  %v95_v27 = vld [vmem:[#allocation6 + $0x160] sm:$0xff]  ;;  %v1620_v29 = vld [vmem:[%s3172_s1 + $0x28] sm:$0xff] }
  0x3a   :  { %2086 = vmatprep.subr.bf16.mxu1 %v2687_v0  ;;  %458 = vperm.xlu1 %2506, %v455_v54   ;;  %v2834_v26 = vpack.c.bf16 %v92_v21, %v89_v20  ;;  %v1191_v31 = vsub.f32 1.0, %v1620_v29  ;;  %v2845_v32 = vpack.c.bf16 %v98_v28, %v95_v27  ;;  %v1623_v35 = vld [vmem:[%s3172_s1 + $0x30] sm:$0xff]  ;;  %v1626_v37 = vld [vmem:[%s3172_s1 + $0x38] sm:$0xff]  ;;  %v100_v40 = vld [vmem:[#allocation3] sm:$0xff]  ;;  %s2691_s1 = smov [#allocation8]  }
  0x3b   :  { %635 = vperm.xlu0 %2505, %v1611_v2   ;;  %v1375_v36 = vsub.f32 1.0, %v1623_v35  ;;  %v1559_v39 = vsub.f32 1.0, %v1626_v37  ;;  %v101_v44 = vld [vmem:[#allocation3 + $0x8] sm:$0xff]  ;;  %v102_v60 = vld [vmem:[#allocation3 + $0x10] sm:$0xff]  ;;  %s1579_s29 = sshll.u32 %s2691_s1, 4  ;;  %s1580_s29 = int_to_ptr.vmem [resolvable:$true] %s1579_s29 }
  0x3c   :  { %2064 = vmatpush1.bf16.msra.mxu0 %v2780_v42  ;;  %s2631_s6 = scalar_lea.vmem %s1580_s29, 1024  ;;  %p2636_p3 = scmp.lt.s32.totalorder %s1580_s29, %s1580_s29 }
  0x3d   :  { %2066 = vmatprep.subr.bf16.mxu0 %v2786_v45  ;;  %2088 = vmatpush3.bf16.msra.mxu1 %v2802_v61  ;;  %p2632_p2 = scmp.ne.s32.totalorder %s1580_s29, %s2631_s6  ;;  %p2637_p4 = scmp.lt.s32.totalorder %s2631_s6, %s2631_s6 }
  0x3e   :  { %2089 = vmatprep.subr.bf16.mxu1 %v2687_v0  ;;  %642 = vperm.xlu1 %2506, %v639_v3  }
  0x3f   :  { %819 = vperm.xlu0 %2505, %v1614_v14   ;;  %p2638_p5 = por %p2637_p4, %p2636_p3 }
  0x40   :  { %2068 = vmatpush1.bf16.msra.mxu0 %v2796_v55 }
  0x41   :  { %2070 = vmatprep.subr.bf16.mxu0 %v2799_v57  ;;  %2091 = vmatpush3.bf16.msra.mxu1 %v2815_v9  ;;  %p2639_p6 = pnand %p2638_p5, %p2632_p2 }
  0x42   :  { %2092 = vmatprep.subr.bf16.mxu1 %v2687_v0  ;;  %826 = vperm.xlu1 %2506, %v823_v15  }
  0x43   :  { %1003 = vperm.xlu0 %2505, %v1617_v24  }
  0x44   :  { %2072 = vmatpush1.bf16.msra.mxu0 %v2809_v4 }
  0x45   :  { %2074 = vmatprep.subr.bf16.mxu0 %v2812_v5  ;;  %2094 = vmatpush3.bf16.msra.mxu1 %v2826_v19 }
  0x46   :  { %2095 = vmatprep.subr.bf16.mxu1 %v2687_v0  ;;  %1010 = vperm.xlu1 %2506, %v1007_v25   ;;  %v282_v25 = vld [vmem:[#allocation3 + $0x18] sm:$0xff] }
  0x47   :  { %1187 = vperm.xlu0 %2505, %v1620_v29  }
  0x48   :  { %2076 = vmatpush1.bf16.msra.mxu0 %v2822_v18 }
  0x49   :  { %2102 = vmatprep.subr.bf16.mxu0 %v2748_v6  ;;  %2097 = vmatpush3.bf16.msra.mxu1 %v2834_v26 }
  0x4a   :  { %2098 = vmatprep.subr.bf16.mxu1 %v2687_v0  ;;  %1194 = vperm.xlu1 %2506, %v1191_v31   ;;  %v283_v31 = vld [vmem:[#allocation3 + $0x20] sm:$0xff] }
  0x4b   :  { %169 = vmatmul.mubr.f32.vlgmr.msra.gmra.mrb[0].mxu0 %v2688_v1  ;;  %1371 = vperm.xlu0 %2505, %v1623_v35  }
  0x4c   :  { %2104 = vmatpush1.bf16.msra.mxu0 %v2750_v10  ;;  %351 = vmatprep.mubr.f32.mxu0 %v2688_v1 }
  0x4d   :  { %2106 = vmatprep.subr.bf16.mxu0 %v2752_v11  ;;  %2100 = vmatpush3.bf16.msra.mxu1 %v2845_v32 }
  0x4e   :  { %2133 = vmatprep.subr.bf16.mxu1 %v2687_v0  ;;  %1378 = vperm.xlu1 %2506, %v1375_v36  }
  0x4f   :  { %1555 = vperm.xlu0 %2505, %v1626_v37  }
  0x50   :  { %2108 = vmatpush1.bf16.msra.mxu0 %v2756_v16  ;;  %1798 = vmatmul.mubr.f32.vlgmr.msra.gmra.mrb[0].mxu1 %v2688_v1 }
  0x51   :  { %2110 = vmatprep.subr.bf16.mxu0 %v2759_v17  ;;  %2135 = vmatpush3.bf16.msra.mxu1 %v2767_v30 }
  0x52   :  { %2136 = vmatprep.subr.bf16.mxu1 %v2687_v0  ;;  %1832 = vmatprep.mubr.msk.f32.mxu1 %vm2689_vm0, %v2688_v1 }
  0x53   :  { %1562 = vperm.xlu1 %2506, %v1559_v39  }
  0x54   :  { %2112 = vmatpush1.bf16.msra.mxu0 %v2762_v22 }
  0x55   :  { %2114 = vmatprep.subr.bf16.mxu0 %v2765_v23  ;;  %2138 = vmatpush3.bf16.msra.mxu1 %v2776_v38 }
  0x56   :  { %2139 = vmatprep.subr.bf16.mxu1 %v2687_v0 }
  0x58   :  { %2116 = vmatpush1.bf16.msra.mxu0 %v2770_v33 }
  0x59   :  { %2118 = vmatprep.subr.bf16.mxu0 %v2773_v34  ;;  %2141 = vmatpush3.bf16.msra.mxu1 %v2789_v49 }
  0x5a   :  { %2142 = vmatprep.subr.bf16.mxu1 %v2687_v0 }
  0x5c   :  { %2120 = vmatpush1.bf16.msra.mxu0 %v2780_v42 }
  0x5d   :  { %2122 = vmatprep.subr.bf16.mxu0 %v2786_v45  ;;  %2144 = vmatpush3.bf16.msra.mxu1 %v2802_v61 }
  0x5e   :  { %2145 = vmatprep.subr.bf16.mxu1 %v2687_v0 }
  0x60   :  { %2124 = vmatpush1.bf16.msra.mxu0 %v2796_v55 }
  0x61   :  { %2126 = vmatprep.subr.bf16.mxu0 %v2799_v57  ;;  %2147 = vmatpush3.bf16.msra.mxu1 %v2815_v9 }
  0x62   :  { %2148 = vmatprep.subr.bf16.mxu1 %v2687_v0 }
  0x64   :  { %2128 = vmatpush1.bf16.msra.mxu0 %v2809_v4 }
  0x65   :  { %2130 = vmatprep.subr.bf16.mxu0 %v2812_v5  ;;  %2150 = vmatpush3.bf16.msra.mxu1 %v2826_v19 }
  0x66   :  { %2151 = vmatprep.subr.bf16.mxu1 %v2687_v0 }
  0x68   :  { %2132 = vmatpush1.bf16.msra.mxu0 %v2822_v18 }
  0x69   :  { %2158 = vmatprep.subr.bf16.mxu0 %v2748_v6  ;;  %2153 = vmatpush3.bf16.msra.mxu1 %v2834_v26 }
  0x6a   :  { %2154 = vmatprep.subr.bf16.mxu1 %v2687_v0 }
  0x6d   :  { %2156 = vmatpush3.bf16.msra.mxu1 %v2845_v32 }
  0x6e   :  { %2189 = vmatprep.subr.bf16.mxu1 %v2687_v0 }
  0xb1   :  { %v269_v3 = vpop.permute.xlu0 %268 }
  0xb6   :  { %v276_v15 = vpop.permute.xlu0 %275 }
  0xb7   :  { %v278_v20 = vmul.f32 0.0, %v276_v15 }
 0x11e   :  { %v170_v41 = vpop.f32.mrb[0].mxu0 }
 0x11f   :  { %v245_v43 = vadd.f32 %v170_v41, %v100_v40  ;;  %v172_v46 = vpop.f32.mrb[1].mxu0 }
 0x120   :  { %v252_v48 = vadd.f32 %v172_v46, %v101_v44 }
 0x121   :  { %v1606_v47 = vmul.f32 -1.442695, %v245_v43 }
 0x122   :  { %v1607_v50 = vmul.f32 -1.442695, %v252_v48  ;;  %v284_v48 = vld [vmem:[#allocation3 + $0x28] sm:$0xff] }
 0x123   :  { %2507 = vpow2.f32 %v1606_v47  ;;  %v241_v51 = vpop.f32.mrb[0].mxu1 }
 0x124   :  { %v1799_v52 = vpop.f32.mrb[1].mxu1  ;;  %2509 = vpow2.f32 %v1607_v50 }
 0x12d   :  { %v2508_v53 = vpop.eup %2507 }
 0x12e   :  { %v249_v54 = vadd.f32 1.0, %v2508_v53  ;;  %v2510_v56 = vpop.eup %2509  ;;  %v452_v53 = vpop.permute.xlu1 %451 }
 0x12f   :  { %v256_v58 = vadd.f32 1.0, %v2510_v56 }
 0x130   :  { %2511 = vrcp.f32 %v249_v54 }
 0x131   :  { %2513 = vrcp.f32 %v256_v58 }
 0x13a   :  { %v2512_v59 = vpop.eup %2511 }
 0x13b   :  { %v259_v62 = vmul.f32 %v2512_v59, %v241_v51  ;;  %v2514_v2 = vpop.eup %2513 }
 0x13c   :  { %v262_v7 = vsub.f32 1.0, %v2514_v2  ;;  %v264_v12 = vmul.f32 0.0, %v2514_v2 }
 0x13d   :  { %v260_v63 = vadd.f32 %v259_v62, %v102_v60  ;;  %v459_v60 = vpop.permute.xlu1 %458 }
 0x13f   :  { %2515 = vtanh.f32 %v260_v63 }
 0x149   :  { %v2516_v8 = vpop.eup %2515 }
 0x14a   :  { %v263_v13 = vmul.f32 %v2516_v8, %v262_v7  ;;  %v466_v7 = vld [vmem:[#allocation3 + $0x30] sm:$0xff] }
 0x14c   :  { %v265_v14 = vadd.f32 %v264_v12, %v263_v13 }
 0x14e   :  { %v271_v21 = vmul.f32 %v269_v3, %v265_v14  ;;  %v467_v14 = vld [vmem:[#allocation3 + $0x38] sm:$0xff] }
 0x150   :  { %v2890_v24 = vadd.f32 %v278_v20, %v271_v21 }
 0x152   :  { %280 = vst [vmem:[#allocation8] sm:$0xff] %v2890_v24  ;;  %352 = vmatmul.mubr.f32.vlgmr.msra.gmra.mrb[2].mxu0 %v2890_v24  ;;  %1833 = vmatmul.mubr.f32.vlgmr.msra.gmra.mrb[2].mxu1 %v2890_v24  ;;  %v461_v63 = vmul.f32 %v459_v60, %v2890_v24  ;;  %v651_v60 = vld [vmem:[#allocation3 + $0x50] sm:$0xff] }
 0x153   :  { %2160 = vmatpush1.bf16.msra.mxu0 %v2750_v10  ;;  %2191 = vmatpush3.bf16.msra.mxu1 %v2767_v30 }
 0x154   :  { %2162 = vmatprep.subr.bf16.mxu0 %v2752_v11  ;;  %2192 = vmatprep.subr.bf16.mxu1 %v2687_v0 }
 0x155   :  { %535 = vmatprep.mubr.f32.mxu0 %v2688_v1  ;;  %1867 = vmatprep.mubr.msk.f32.mxu1 %vm2689_vm0, %v2688_v1 }
 0x157   :  { %2164 = vmatpush1.bf16.msra.mxu0 %v2756_v16  ;;  %2194 = vmatpush3.bf16.msra.mxu1 %v2776_v38 }
 0x158   :  { %2166 = vmatprep.subr.bf16.mxu0 %v2759_v17  ;;  %2195 = vmatprep.subr.bf16.mxu1 %v2687_v0 }
 0x15b   :  { %2168 = vmatpush1.bf16.msra.mxu0 %v2762_v22  ;;  %2197 = vmatpush3.bf16.msra.mxu1 %v2789_v49 }
 0x15c   :  { %2170 = vmatprep.subr.bf16.mxu0 %v2765_v23  ;;  %2198 = vmatprep.subr.bf16.mxu1 %v2687_v0 }
 0x15f   :  { %2172 = vmatpush1.bf16.msra.mxu0 %v2770_v33  ;;  %2200 = vmatpush3.bf16.msra.mxu1 %v2802_v61 }
 0x160   :  { %2174 = vmatprep.subr.bf16.mxu0 %v2773_v34  ;;  %2201 = vmatprep.subr.bf16.mxu1 %v2687_v0 }
 0x163   :  { %2176 = vmatpush1.bf16.msra.mxu0 %v2780_v42  ;;  %2203 = vmatpush3.bf16.msra.mxu1 %v2815_v9 }
 0x164   :  { %2178 = vmatprep.subr.bf16.mxu0 %v2786_v45  ;;  %2204 = vmatprep.subr.bf16.mxu1 %v2687_v0 }
 0x167   :  { %2180 = vmatpush1.bf16.msra.mxu0 %v2796_v55  ;;  %2206 = vmatpush3.bf16.msra.mxu1 %v2826_v19 }
 0x168   :  { %2182 = vmatprep.subr.bf16.mxu0 %v2799_v57  ;;  %2207 = vmatprep.subr.bf16.mxu1 %v2687_v0 }
 0x16b   :  { %2184 = vmatpush1.bf16.msra.mxu0 %v2809_v4  ;;  %2209 = vmatpush3.bf16.msra.mxu1 %v2834_v26 }
 0x16c   :  { %2186 = vmatprep.subr.bf16.mxu0 %v2812_v5  ;;  %2210 = vmatprep.subr.bf16.mxu1 %v2687_v0 }
 0x16f   :  { %2188 = vmatpush1.bf16.msra.mxu0 %v2822_v18  ;;  %2212 = vmatpush3.bf16.msra.mxu1 %v2845_v32 }
 0x170   :  { %2214 = vmatprep.subr.bf16.mxu0 %v2748_v6  ;;  %2245 = vmatprep.subr.bf16.mxu1 %v2687_v0 }
 0x225   :  { %v353_v27 = vpop.f32.mrb[2].mxu0  ;;  %v424_v28 = vpop.f32.mrb[2].mxu1 }
 0x226   :  { %v428_v29 = vadd.f32 %v353_v27, %v282_v25  ;;  %v355_v35 = vpop.f32.mrb[3].mxu0  ;;  %v1834_v36 = vpop.f32.mrb[3].mxu1 }
 0x227   :  { %v435_v39 = vadd.f32 %v355_v35, %v283_v31  ;;  %v468_v36 = vld [vmem:[#allocation3 + $0x40] sm:$0xff] }
 0x228   :  { %v1609_v37 = vmul.f32 -1.442695, %v428_v29 }
 0x229   :  { %v1610_v40 = vmul.f32 -1.442695, %v435_v39 }
 0x22a   :  { %2517 = vpow2.f32 %v1609_v37 }
 0x22b   :  { %2519 = vpow2.f32 %v1610_v40 }
 0x234   :  { %v2518_v41 = vpop.eup %2517 }
 0x235   :  { %v432_v43 = vadd.f32 1.0, %v2518_v41  ;;  %v2520_v44 = vpop.eup %2519 }
 0x236   :  { %v439_v46 = vadd.f32 1.0, %v2520_v44 }
 0x237   :  { %2521 = vrcp.f32 %v432_v43 }
 0x238   :  { %2523 = vrcp.f32 %v439_v46 }
 0x241   :  { %v2522_v47 = vpop.eup %2521 }
 0x242   :  { %v442_v50 = vmul.f32 %v2522_v47, %v424_v28  ;;  %v2524_v52 = vpop.eup %2523 }
 0x243   :  { %v445_v54 = vsub.f32 1.0, %v2524_v52  ;;  %v447_v59 = vmul.f32 %v2524_v52, %v2890_v24 }
 0x244   :  { %v443_v51 = vadd.f32 %v442_v50, %v284_v48  ;;  %v636_v48 = vpop.permute.xlu0 %635  ;;  %v643_v50 = vpop.permute.xlu1 %642 }
 0x246   :  { %2525 = vtanh.f32 %v443_v51 }
 0x250   :  { %v2526_v56 = vpop.eup %2525 }
 0x251   :  { %v446_v58 = vmul.f32 %v2526_v56, %v445_v54  ;;  %v650_v54 = vld [vmem:[#allocation3 + $0x48] sm:$0xff] }
 0x253   :  { %v448_v62 = vadd.f32 %v447_v59, %v446_v58 }
 0x255   :  { %v454_v2 = vmul.f32 %v452_v53, %v448_v62 }
 0x257   :  { %v2932_v3 = vadd.f32 %v461_v63, %v454_v2 }
 0x259   :  { %464 = vst [vmem:[#allocation8 + $0x8] sm:$0xff] %v2932_v3  ;;  %536 = vmatmul.mubr.f32.vlgmr.msra.gmra.mrb[4].mxu0 %v2932_v3  ;;  %1868 = vmatmul.mubr.f32.vlgmr.msra.gmra.mrb[4].mxu1 %v2932_v3  ;;  %v645_v51 = vmul.f32 %v643_v50, %v2932_v3 }
 0x25a   :  { %2216 = vmatpush1.bf16.msra.mxu0 %v2750_v10  ;;  %2247 = vmatpush3.bf16.msra.mxu1 %v2767_v30 }
 0x25b   :  { %2218 = vmatprep.subr.bf16.mxu0 %v2752_v11  ;;  %2248 = vmatprep.subr.bf16.mxu1 %v2687_v0 }
 0x25c   :  { %719 = vmatprep.mubr.f32.mxu0 %v2688_v1  ;;  %1902 = vmatprep.mubr.msk.f32.mxu1 %vm2689_vm0, %v2688_v1 }
 0x25e   :  { %2220 = vmatpush1.bf16.msra.mxu0 %v2756_v16  ;;  %2250 = vmatpush3.bf16.msra.mxu1 %v2776_v38 }
 0x25f   :  { %2222 = vmatprep.subr.bf16.mxu0 %v2759_v17  ;;  %2251 = vmatprep.subr.bf16.mxu1 %v2687_v0 }
 0x262   :  { %2224 = vmatpush1.bf16.msra.mxu0 %v2762_v22  ;;  %2253 = vmatpush3.bf16.msra.mxu1 %v2789_v49 }
 0x263   :  { %2226 = vmatprep.subr.bf16.mxu0 %v2765_v23  ;;  %2254 = vmatprep.subr.bf16.mxu1 %v2687_v0 }
 0x266   :  { %2228 = vmatpush1.bf16.msra.mxu0 %v2770_v33  ;;  %2256 = vmatpush3.bf16.msra.mxu1 %v2802_v61 }
 0x267   :  { %2230 = vmatprep.subr.bf16.mxu0 %v2773_v34  ;;  %2257 = vmatprep.subr.bf16.mxu1 %v2687_v0 }
 0x26a   :  { %2232 = vmatpush1.bf16.msra.mxu0 %v2780_v42  ;;  %2259 = vmatpush3.bf16.msra.mxu1 %v2815_v9 }
 0x26b   :  { %2234 = vmatprep.subr.bf16.mxu0 %v2786_v45  ;;  %2260 = vmatprep.subr.bf16.mxu1 %v2687_v0 }
 0x26e   :  { %2236 = vmatpush1.bf16.msra.mxu0 %v2796_v55  ;;  %2262 = vmatpush3.bf16.msra.mxu1 %v2826_v19 }
 0x26f   :  { %2238 = vmatprep.subr.bf16.mxu0 %v2799_v57  ;;  %2263 = vmatprep.subr.bf16.mxu1 %v2687_v0 }
 0x272   :  { %2240 = vmatpush1.bf16.msra.mxu0 %v2809_v4  ;;  %2265 = vmatpush3.bf16.msra.mxu1 %v2834_v26 }
 0x273   :  { %2242 = vmatprep.subr.bf16.mxu0 %v2812_v5  ;;  %2266 = vmatprep.subr.bf16.mxu1 %v2687_v0 }
 0x276   :  { %2244 = vmatpush1.bf16.msra.mxu0 %v2822_v18  ;;  %2268 = vmatpush3.bf16.msra.mxu1 %v2845_v32 }
 0x277   :  { %2270 = vmatprep.subr.bf16.mxu0 %v2748_v6  ;;  %2301 = vmatprep.subr.bf16.mxu1 %v2687_v0 }
 0x32c   :  { %v537_v8 = vpop.f32.mrb[4].mxu0  ;;  %v608_v12 = vpop.f32.mrb[4].mxu1 }
 0x32d   :  { %v612_v13 = vadd.f32 %v537_v8, %v466_v7  ;;  %v539_v15 = vpop.f32.mrb[5].mxu0  ;;  %v1869_v20 = vpop.f32.mrb[5].mxu1 }
 0x32e   :  { %v619_v24 = vadd.f32 %v539_v15, %v467_v14  ;;  %v652_v20 = vld [vmem:[#allocation3 + $0x58] sm:$0xff] }
 0x32f   :  { %v1612_v21 = vmul.f32 -1.442695, %v612_v13 }
 0x330   :  { %v1613_v25 = vmul.f32 -1.442695, %v619_v24 }
 0x331   :  { %2527 = vpow2.f32 %v1612_v21 }
 0x332   :  { %2529 = vpow2.f32 %v1613_v25 }
 0x33b   :  { %v2528_v27 = vpop.eup %2527 }
 0x33c   :  { %v616_v28 = vadd.f32 1.0, %v2528_v27  ;;  %v2530_v29 = vpop.eup %2529 }
 0x33d   :  { %v623_v31 = vadd.f32 1.0, %v2530_v29 }
 0x33e   :  { %2531 = vrcp.f32 %v616_v28 }
 0x33f   :  { %2533 = vrcp.f32 %v623_v31 }
 0x348   :  { %v2532_v35 = vpop.eup %2531 }
 0x349   :  { %v626_v37 = vmul.f32 %v2532_v35, %v608_v12  ;;  %v2534_v40 = vpop.eup %2533 }
 0x34a   :  { %v629_v41 = vsub.f32 1.0, %v2534_v40  ;;  %v631_v46 = vmul.f32 %v2534_v40, %v2932_v3 }
 0x34b   :  { %v627_v39 = vadd.f32 %v626_v37, %v468_v36  ;;  %v820_v36 = vpop.permute.xlu0 %819  ;;  %v827_v37 = vpop.permute.xlu1 %826 }
 0x34d   :  { %2535 = vtanh.f32 %v627_v39 }
 0x357   :  { %v2536_v43 = vpop.eup %2535 }
 0x358   :  { %v630_v44 = vmul.f32 %v2536_v43, %v629_v41  ;;  %v834_v43 = vld [vmem:[#allocation3 + $0x60] sm:$0xff] }
 0x35a   :  { %v632_v47 = vadd.f32 %v631_v46, %v630_v44 }
 0x35c   :  { %v638_v52 = vmul.f32 %v636_v48, %v632_v47  ;;  %v835_v48 = vld [vmem:[#allocation3 + $0x68] sm:$0xff] }
 0x35e   :  { %v2974_v53 = vadd.f32 %v645_v51, %v638_v52 }
 0x360   :  { %648 = vst [vmem:[#allocation8 + $0x10] sm:$0xff] %v2974_v53  ;;  %720 = vmatmul.mubr.f32.vlgmr.msra.gmra.mrb[6].mxu0 %v2974_v53  ;;  %1903 = vmatmul.mubr.f32.vlgmr.msra.gmra.mrb[6].mxu1 %v2974_v53  ;;  %v829_v40 = vmul.f32 %v827_v37, %v2974_v53 }
 0x361   :  { %2272 = vmatpush1.bf16.msra.mxu0 %v2750_v10  ;;  %2303 = vmatpush3.bf16.msra.mxu1 %v2767_v30 }
 0x362   :  { %2274 = vmatprep.subr.bf16.mxu0 %v2752_v11  ;;  %2304 = vmatprep.subr.bf16.mxu1 %v2687_v0 }
 0x363   :  { %903 = vmatprep.mubr.f32.mxu0 %v2688_v1  ;;  %1937 = vmatprep.mubr.msk.f32.mxu1 %vm2689_vm0, %v2688_v1 }
 0x365   :  { %2276 = vmatpush1.bf16.msra.mxu0 %v2756_v16  ;;  %2306 = vmatpush3.bf16.msra.mxu1 %v2776_v38 }
 0x366   :  { %2278 = vmatprep.subr.bf16.mxu0 %v2759_v17  ;;  %2307 = vmatprep.subr.bf16.mxu1 %v2687_v0 }
 0x369   :  { %2280 = vmatpush1.bf16.msra.mxu0 %v2762_v22  ;;  %2309 = vmatpush3.bf16.msra.mxu1 %v2789_v49 }
 0x36a   :  { %2282 = vmatprep.subr.bf16.mxu0 %v2765_v23  ;;  %2310 = vmatprep.subr.bf16.mxu1 %v2687_v0 }
 0x36d   :  { %2284 = vmatpush1.bf16.msra.mxu0 %v2770_v33  ;;  %2312 = vmatpush3.bf16.msra.mxu1 %v2802_v61 }
 0x36e   :  { %2286 = vmatprep.subr.bf16.mxu0 %v2773_v34  ;;  %2313 = vmatprep.subr.bf16.mxu1 %v2687_v0 }
 0x371   :  { %2288 = vmatpush1.bf16.msra.mxu0 %v2780_v42  ;;  %2315 = vmatpush3.bf16.msra.mxu1 %v2815_v9 }
 0x372   :  { %2290 = vmatprep.subr.bf16.mxu0 %v2786_v45  ;;  %2316 = vmatprep.subr.bf16.mxu1 %v2687_v0 }
 0x375   :  { %2292 = vmatpush1.bf16.msra.mxu0 %v2796_v55  ;;  %2318 = vmatpush3.bf16.msra.mxu1 %v2826_v19 }
 0x376   :  { %2294 = vmatprep.subr.bf16.mxu0 %v2799_v57  ;;  %2319 = vmatprep.subr.bf16.mxu1 %v2687_v0 }
 0x379   :  { %2296 = vmatpush1.bf16.msra.mxu0 %v2809_v4  ;;  %2321 = vmatpush3.bf16.msra.mxu1 %v2834_v26 }
 0x37a   :  { %2298 = vmatprep.subr.bf16.mxu0 %v2812_v5  ;;  %2322 = vmatprep.subr.bf16.mxu1 %v2687_v0 }
 0x37d   :  { %2300 = vmatpush1.bf16.msra.mxu0 %v2822_v18  ;;  %2324 = vmatpush3.bf16.msra.mxu1 %v2845_v32 }
 0x37e   :  { %2326 = vmatprep.subr.bf16.mxu0 %v2748_v6  ;;  %2357 = vmatprep.subr.bf16.mxu1 %v2687_v0 }
 0x433   :  { %v721_v56 = vpop.f32.mrb[6].mxu0  ;;  %v792_v58 = vpop.f32.mrb[6].mxu1 }
 0x434   :  { %v796_v59 = vadd.f32 %v721_v56, %v650_v54  ;;  %v723_v62 = vpop.f32.mrb[7].mxu0  ;;  %v1904_v63 = vpop.f32.mrb[7].mxu1 }
 0x435   :  { %v803_v3 = vadd.f32 %v723_v62, %v651_v60  ;;  %v836_v63 = vld [vmem:[#allocation3 + $0x70] sm:$0xff] }
 0x436   :  { %v1615_v2 = vmul.f32 -1.442695, %v796_v59 }
 0x437   :  { %v1616_v7 = vmul.f32 -1.442695, %v803_v3 }
 0x438   :  { %2537 = vpow2.f32 %v1615_v2 }
 0x439   :  { %2539 = vpow2.f32 %v1616_v7 }
 0x442   :  { %v2538_v8 = vpop.eup %2537 }
 0x443   :  { %v800_v12 = vadd.f32 1.0, %v2538_v8  ;;  %v2540_v13 = vpop.eup %2539 }
 0x444   :  { %v807_v14 = vadd.f32 1.0, %v2540_v13 }
 0x445   :  { %2541 = vrcp.f32 %v800_v12 }
 0x446   :  { %2543 = vrcp.f32 %v807_v14 }
 0x44f   :  { %v2542_v15 = vpop.eup %2541 }
 0x450   :  { %v810_v21 = vmul.f32 %v2542_v15, %v792_v58  ;;  %v2544_v25 = vpop.eup %2543 }
 0x451   :  { %v813_v27 = vsub.f32 1.0, %v2544_v25  ;;  %v815_v31 = vmul.f32 %v2544_v25, %v2974_v53 }
 0x452   :  { %v811_v24 = vadd.f32 %v810_v21, %v652_v20  ;;  %v1004_v20 = vpop.permute.xlu0 %1003  ;;  %v1011_v21 = vpop.permute.xlu1 %1010 }
 0x454   :  { %2545 = vtanh.f32 %v811_v24 }
 0x45e   :  { %v2546_v28 = vpop.eup %2545 }
 0x45f   :  { %v814_v29 = vmul.f32 %v2546_v28, %v813_v27  ;;  %v1018_v28 = vld [vmem:[#allocation3 + $0x78] sm:$0xff] }
 0x461   :  { %v816_v35 = vadd.f32 %v815_v31, %v814_v29 }
 0x463   :  { %v822_v39 = vmul.f32 %v820_v36, %v816_v35  ;;  %v1019_v36 = vld [vmem:[#allocation3 + $0x80] sm:$0xff] }
 0x465   :  { %v3016_v41 = vadd.f32 %v829_v40, %v822_v39 }
 0x467   :  { %832 = vst [vmem:[#allocation8 + $0x18] sm:$0xff] %v3016_v41  ;;  %904 = vmatmul.mubr.f32.vlgmr.msra.gmra.mrb[8].mxu0 %v3016_v41  ;;  %1938 = vmatmul.mubr.f32.vlgmr.msra.gmra.mrb[8].mxu1 %v3016_v41  ;;  %v1013_v25 = vmul.f32 %v1011_v21, %v3016_v41 }
 0x468   :  { %2328 = vmatpush1.bf16.msra.mxu0 %v2750_v10  ;;  %2359 = vmatpush3.bf16.msra.mxu1 %v2767_v30 }
 0x469   :  { %2330 = vmatprep.subr.bf16.mxu0 %v2752_v11  ;;  %2360 = vmatprep.subr.bf16.mxu1 %v2687_v0 }
 0x46a   :  { %1087 = vmatprep.mubr.f32.mxu0 %v2688_v1  ;;  %1972 = vmatprep.mubr.msk.f32.mxu1 %vm2689_vm0, %v2688_v1 }
 0x46c   :  { %2332 = vmatpush1.bf16.msra.mxu0 %v2756_v16  ;;  %2362 = vmatpush3.bf16.msra.mxu1 %v2776_v38 }
 0x46d   :  { %2334 = vmatprep.subr.bf16.mxu0 %v2759_v17  ;;  %2363 = vmatprep.subr.bf16.mxu1 %v2687_v0 }
 0x470   :  { %2336 = vmatpush1.bf16.msra.mxu0 %v2762_v22  ;;  %2365 = vmatpush3.bf16.msra.mxu1 %v2789_v49 }
 0x471   :  { %2338 = vmatprep.subr.bf16.mxu0 %v2765_v23  ;;  %2366 = vmatprep.subr.bf16.mxu1 %v2687_v0 }
 0x474   :  { %2340 = vmatpush1.bf16.msra.mxu0 %v2770_v33  ;;  %2368 = vmatpush3.bf16.msra.mxu1 %v2802_v61 }
 0x475   :  { %2342 = vmatprep.subr.bf16.mxu0 %v2773_v34  ;;  %2369 = vmatprep.subr.bf16.mxu1 %v2687_v0 }
 0x478   :  { %2344 = vmatpush1.bf16.msra.mxu0 %v2780_v42  ;;  %2371 = vmatpush3.bf16.msra.mxu1 %v2815_v9 }
 0x479   :  { %2346 = vmatprep.subr.bf16.mxu0 %v2786_v45  ;;  %2372 = vmatprep.subr.bf16.mxu1 %v2687_v0 }
 0x47c   :  { %2348 = vmatpush1.bf16.msra.mxu0 %v2796_v55  ;;  %2374 = vmatpush3.bf16.msra.mxu1 %v2826_v19 }
 0x47d   :  { %2350 = vmatprep.subr.bf16.mxu0 %v2799_v57  ;;  %2375 = vmatprep.subr.bf16.mxu1 %v2687_v0 }
 0x480   :  { %2352 = vmatpush1.bf16.msra.mxu0 %v2809_v4  ;;  %2377 = vmatpush3.bf16.msra.mxu1 %v2834_v26 }
 0x481   :  { %2354 = vmatprep.subr.bf16.mxu0 %v2812_v5  ;;  %2378 = vmatprep.subr.bf16.mxu1 %v2687_v0 }
 0x484   :  { %2356 = vmatpush1.bf16.msra.mxu0 %v2822_v18  ;;  %2380 = vmatpush3.bf16.msra.mxu1 %v2845_v32 }
 0x485   :  { %2382 = vmatprep.subr.bf16.mxu0 %v2748_v6  ;;  %2413 = vmatprep.subr.bf16.mxu1 %v2687_v0 }
 0x53a   :  { %v905_v44 = vpop.f32.mrb[8].mxu0  ;;  %v976_v46 = vpop.f32.mrb[8].mxu1 }
 0x53b   :  { %v980_v47 = vadd.f32 %v905_v44, %v834_v43  ;;  %v907_v50 = vpop.f32.mrb[9].mxu0  ;;  %v1939_v51 = vpop.f32.mrb[9].mxu1 }
 0x53c   :  { %v987_v53 = vadd.f32 %v907_v50, %v835_v48  ;;  %v1020_v50 = vld [vmem:[#allocation3 + $0x88] sm:$0xff] }
 0x53d   :  { %v1618_v52 = vmul.f32 -1.442695, %v980_v47 }
 0x53e   :  { %v1619_v54 = vmul.f32 -1.442695, %v987_v53 }
 0x53f   :  { %2547 = vpow2.f32 %v1618_v52 }
 0x540   :  { %2549 = vpow2.f32 %v1619_v54 }
 0x549   :  { %v2548_v56 = vpop.eup %2547 }
 0x54a   :  { %v984_v58 = vadd.f32 1.0, %v2548_v56  ;;  %v2550_v59 = vpop.eup %2549 }
 0x54b   :  { %v991_v60 = vadd.f32 1.0, %v2550_v59 }
 0x54c   :  { %2551 = vrcp.f32 %v984_v58 }
 0x54d   :  { %2553 = vrcp.f32 %v991_v60 }
 0x556   :  { %v2552_v62 = vpop.eup %2551 }
 0x557   :  { %v994_v2 = vmul.f32 %v2552_v62, %v976_v46  ;;  %v2554_v7 = vpop.eup %2553  ;;  %v1188_v62 = vpop.permute.xlu0 %1187 }
 0x558   :  { %v997_v8 = vsub.f32 1.0, %v2554_v7  ;;  %v999_v14 = vmul.f32 %v2554_v7, %v3016_v41 }
 0x559   :  { %v995_v3 = vadd.f32 %v994_v2, %v836_v63  ;;  %v1195_v63 = vpop.permute.xlu1 %1194 }
 0x55b   :  { %2555 = vtanh.f32 %v995_v3 }
 0x565   :  { %v2556_v12 = vpop.eup %2555 }
 0x566   :  { %v998_v13 = vmul.f32 %v2556_v12, %v997_v8  ;;  %v1379_v8 = vpop.permute.xlu1 %1378 }
 0x568   :  { %v1000_v15 = vadd.f32 %v999_v14, %v998_v13 }
 0x56a   :  { %v1006_v24 = vmul.f32 %v1004_v20, %v1000_v15  ;;  %v1386_v15 = vld [vmem:[#allocation3 + $0xa8] sm:$0xff] }
 0x56c   :  { %v3058_v27 = vadd.f32 %v1013_v25, %v1006_v24  ;;  %v1387_v25 = vld [vmem:[#allocation3 + $0xb0] sm:$0xff] }
 0x56e   :  { %1016 = vst [vmem:[#allocation8 + $0x20] sm:$0xff] %v3058_v27  ;;  %1088 = vmatmul.mubr.f32.vlgmr.msra.gmra.mrb[10].mxu0 %v3058_v27  ;;  %1973 = vmatmul.mubr.f32.vlgmr.msra.gmra.mrb[10].mxu1 %v3058_v27  ;;  %v1197_v3 = vmul.f32 %v1195_v63, %v3058_v27 }
 0x56f   :  { %2384 = vmatpush1.bf16.msra.mxu0 %v2750_v10  ;;  %2415 = vmatpush3.bf16.msra.mxu1 %v2767_v30 }
 0x570   :  { %2386 = vmatprep.subr.bf16.mxu0 %v2752_v11  ;;  %2416 = vmatprep.subr.bf16.mxu1 %v2687_v0 }
 0x571   :  { %1271 = vmatprep.mubr.f32.mxu0 %v2688_v1  ;;  %2007 = vmatprep.mubr.msk.f32.mxu1 %vm2689_vm0, %v2688_v1 }
 0x573   :  { %2388 = vmatpush1.bf16.msra.mxu0 %v2756_v16  ;;  %2418 = vmatpush3.bf16.msra.mxu1 %v2776_v38 }
 0x574   :  { %2390 = vmatprep.subr.bf16.mxu0 %v2759_v17  ;;  %2419 = vmatprep.subr.bf16.mxu1 %v2687_v0 }
 0x577   :  { %2392 = vmatpush1.bf16.msra.mxu0 %v2762_v22  ;;  %2421 = vmatpush3.bf16.msra.mxu1 %v2789_v49 }
 0x578   :  { %2394 = vmatprep.subr.bf16.mxu0 %v2765_v23  ;;  %2422 = vmatprep.subr.bf16.mxu1 %v2687_v0 }
 0x57b   :  { %2396 = vmatpush1.bf16.msra.mxu0 %v2770_v33  ;;  %2424 = vmatpush3.bf16.msra.mxu1 %v2802_v61 }
 0x57c   :  { %2398 = vmatprep.subr.bf16.mxu0 %v2773_v34  ;;  %2425 = vmatprep.subr.bf16.mxu1 %v2687_v0 }
 0x57f   :  { %2400 = vmatpush1.bf16.msra.mxu0 %v2780_v42  ;;  %2427 = vmatpush3.bf16.msra.mxu1 %v2815_v9 }
 0x580   :  { %2402 = vmatprep.subr.bf16.mxu0 %v2786_v45  ;;  %2428 = vmatprep.subr.bf16.mxu1 %v2687_v0 }
 0x583   :  { %2404 = vmatpush1.bf16.msra.mxu0 %v2796_v55  ;;  %2430 = vmatpush3.bf16.msra.mxu1 %v2826_v19 }
 0x584   :  { %2406 = vmatprep.subr.bf16.mxu0 %v2799_v57  ;;  %2431 = vmatprep.subr.bf16.mxu1 %v2687_v0 }
 0x587   :  { %2408 = vmatpush1.bf16.msra.mxu0 %v2809_v4  ;;  %2433 = vmatpush3.bf16.msra.mxu1 %v2834_v26 }
 0x588   :  { %2410 = vmatprep.subr.bf16.mxu0 %v2812_v5  ;;  %2434 = vmatprep.subr.bf16.mxu1 %v2687_v0 }
 0x58b   :  { %2412 = vmatpush1.bf16.msra.mxu0 %v2822_v18  ;;  %2436 = vmatpush3.bf16.msra.mxu1 %v2845_v32 }
 0x58c   :  { %2438 = vmatprep.subr.bf16.mxu0 %v2748_v6  ;;  %2469 = vmatprep.subr.bf16.mxu1 %v2687_v0 }
 0x641   :  { %v1089_v29 = vpop.f32.mrb[10].mxu0  ;;  %v1160_v31 = vpop.f32.mrb[10].mxu1 }
 0x642   :  { %v1164_v35 = vadd.f32 %v1089_v29, %v1018_v28  ;;  %v1091_v37 = vpop.f32.mrb[11].mxu0  ;;  %v1974_v39 = vpop.f32.mrb[11].mxu1 }
 0x643   :  { %v1171_v41 = vadd.f32 %v1091_v37, %v1019_v36 }
 0x644   :  { %v1621_v40 = vmul.f32 -1.442695, %v1164_v35 }
 0x645   :  { %v1622_v43 = vmul.f32 -1.442695, %v1171_v41 }
 0x646   :  { %2557 = vpow2.f32 %v1621_v40 }
 0x647   :  { %2559 = vpow2.f32 %v1622_v43  ;;  %v1388_v43 = vld [vmem:[#allocation3 + $0xb8] sm:$0xff] }
 0x650   :  { %v2558_v44 = vpop.eup %2557 }
 0x651   :  { %v1168_v46 = vadd.f32 1.0, %v2558_v44  ;;  %v2560_v47 = vpop.eup %2559 }
 0x652   :  { %v1175_v48 = vadd.f32 1.0, %v2560_v47 }
 0x653   :  { %2561 = vrcp.f32 %v1168_v46 }
 0x654   :  { %2563 = vrcp.f32 %v1175_v48 }
 0x65d   :  { %v2562_v6 = vpop.eup %2561 }
 0x65e   :  { %v1178_v51 = vmul.f32 %v2562_v6, %v1160_v31  ;;  %v2564_v53 = vpop.eup %2563 }
 0x65f   :  { %v1181_v54 = vsub.f32 1.0, %v2564_v53  ;;  %v1183_v59 = vmul.f32 %v2564_v53, %v3058_v27 }
 0x660   :  { %v1179_v52 = vadd.f32 %v1178_v51, %v1020_v50 }
 0x662   :  { %2565 = vtanh.f32 %v1179_v52 }
 0x66c   :  { %v2566_v56 = vpop.eup %2565 }
 0x66d   :  { %v1182_v58 = vmul.f32 %v2566_v56, %v1181_v54  ;;  %v1563_v54 = vpop.permute.xlu1 %1562 }
 0x66f   :  { %v1184_v60 = vadd.f32 %v1183_v59, %v1182_v58 }
 0x671   :  { %v1190_v2 = vmul.f32 %v1188_v62, %v1184_v60 }
 0x673   :  { %v3100_v7 = vadd.f32 %v1197_v3, %v1190_v2 }
 0x675   :  { %1200 = vst [vmem:[#allocation8 + $0x28] sm:$0xff] %v3100_v7  ;;  %1272 = vmatmul.mubr.f32.vlgmr.msra.gmra.mrb[12].mxu0 %v3100_v7  ;;  %2008 = vmatmul.mubr.f32.vlgmr.msra.gmra.mrb[12].mxu1 %v3100_v7  ;;  %v1381_v13 = vmul.f32 %v1379_v8, %v3100_v7 }
 0x676   :  { %2440 = vmatpush1.bf16.msra.mxu0 %v2750_v10  ;;  %2471 = vmatpush3.bf16.msra.mxu1 %v2767_v30 }
 0x677   :  { %2442 = vmatprep.subr.bf16.mxu0 %v2752_v11  ;;  %2472 = vmatprep.subr.bf16.mxu1 %v2687_v0 }
 0x678   :  { %1455 = vmatprep.mubr.f32.mxu0 %v2688_v1  ;;  %2042 = vmatprep.mubr.msk.f32.mxu1 %vm2689_vm0, %v2688_v1  ;;  %v1202_v1 = vld [vmem:[#allocation3 + $0x90] sm:$0xff] }
 0x67a   :  { %2444 = vmatpush1.bf16.msra.mxu0 %v2756_v16  ;;  %2474 = vmatpush3.bf16.msra.mxu1 %v2776_v38 }
 0x67b   :  { %2446 = vmatprep.subr.bf16.mxu0 %v2759_v17  ;;  %2475 = vmatprep.subr.bf16.mxu1 %v2687_v0  ;;  %v1203_v17 = vld [vmem:[#allocation3 + $0x98] sm:$0xff] }
 0x67e   :  { %2448 = vmatpush1.bf16.msra.mxu0 %v2762_v22  ;;  %2477 = vmatpush3.bf16.msra.mxu1 %v2789_v49 }
 0x67f   :  { %2450 = vmatprep.subr.bf16.mxu0 %v2765_v23  ;;  %2478 = vmatprep.subr.bf16.mxu1 %v2687_v0 }
 0x682   :  { %2452 = vmatpush1.bf16.msra.mxu0 %v2770_v33  ;;  %2480 = vmatpush3.bf16.msra.mxu1 %v2802_v61 }
 0x683   :  { %2454 = vmatprep.subr.bf16.mxu0 %v2773_v34  ;;  %2481 = vmatprep.subr.bf16.mxu1 %v2687_v0 }
 0x686   :  { %2456 = vmatpush1.bf16.msra.mxu0 %v2780_v42  ;;  %2483 = vmatpush3.bf16.msra.mxu1 %v2815_v9 }
 0x687   :  { %2458 = vmatprep.subr.bf16.mxu0 %v2786_v45  ;;  %2484 = vmatprep.subr.bf16.mxu1 %v2687_v0 }
 0x68a   :  { %2460 = vmatpush1.bf16.msra.mxu0 %v2796_v55  ;;  %2486 = vmatpush3.bf16.msra.mxu1 %v2826_v19  ;;  %v1204_v55 = vld [vmem:[#allocation3 + $0xa0] sm:$0xff] }
 0x68b   :  { %2462 = vmatprep.subr.bf16.mxu0 %v2799_v57  ;;  %2487 = vmatprep.subr.bf16.mxu1 %v2687_v0 }
 0x68e   :  { %2464 = vmatpush1.bf16.msra.mxu0 %v2809_v4  ;;  %2489 = vmatpush3.bf16.msra.mxu1 %v2834_v26 }
 0x68f   :  { %2466 = vmatprep.subr.bf16.mxu0 %v2812_v5  ;;  %2490 = vmatprep.subr.bf16.mxu1 %v2687_v0 }
 0x692   :  { %2468 = vmatpush1.bf16.msra.mxu0 %v2822_v18  ;;  %2492 = vmatpush3.bf16.msra.mxu1 %v2845_v32  ;;  %v1372_v32 = vpop.permute.xlu0 %1371 }
 0x696   :  { %v1556_v53 = vpop.permute.xlu0 %1555 }
 0x748   :  { %v1273_v10 = vpop.f32.mrb[12].mxu0  ;;  %v1344_v11 = vpop.f32.mrb[12].mxu1 }
 0x749   :  { %v1348_v16 = vadd.f32 %v1273_v10, %v1202_v1  ;;  %v1275_v22 = vpop.f32.mrb[13].mxu0  ;;  %v2009_v23 = vpop.f32.mrb[13].mxu1 }
 0x74a   :  { %v1355_v33 = vadd.f32 %v1275_v22, %v1203_v17 }
 0x74b   :  { %v1624_v30 = vmul.f32 -1.442695, %v1348_v16 }
 0x74c   :  { %v1625_v34 = vmul.f32 -1.442695, %v1355_v33 }
 0x74d   :  { %2567 = vpow2.f32 %v1624_v30 }
 0x74e   :  { %2569 = vpow2.f32 %v1625_v34 }
 0x757   :  { %v2568_v38 = vpop.eup %2567 }
 0x758   :  { %v1352_v42 = vadd.f32 1.0, %v2568_v38  ;;  %v2570_v0 = vpop.eup %2569 }
 0x759   :  { %v1359_v45 = vadd.f32 1.0, %v2570_v0 }
 0x75a   :  { %2571 = vrcp.f32 %v1352_v42 }
 0x75b   :  { %2573 = vrcp.f32 %v1359_v45 }
 0x764   :  { %v2572_v49 = vpop.eup %2571 }
 0x765   :  { %v1362_v57 = vmul.f32 %v2572_v49, %v1344_v11  ;;  %v2574_v4 = vpop.eup %2573 }
 0x766   :  { %v1365_v5 = vsub.f32 1.0, %v2574_v4  ;;  %v1367_v19 = vmul.f32 %v2574_v4, %v3100_v7 }
 0x767   :  { %v1363_v61 = vadd.f32 %v1362_v57, %v1204_v55 }
 0x769   :  { %2575 = vtanh.f32 %v1363_v61 }
 0x773   :  { %v2576_v9 = vpop.eup %2575 }
 0x774   :  { %v1366_v18 = vmul.f32 %v2576_v9, %v1365_v5 }
 0x776   :  { %v1368_v26 = vadd.f32 %v1367_v19, %v1366_v18 }
 0x778   :  { %v1374_v12 = vmul.f32 %v1372_v32, %v1368_v26 }
 0x77a   :  { %v1382_v14 = vadd.f32 %v1381_v13, %v1374_v12 }
 0x77c   :  { %1384 = vst [vmem:[#allocation8 + $0x30] sm:$0xff] %v1382_v14  ;;  %1456 = vmatmul.mubr.f32.vlgmr.msra.gmra.mrb[14].mxu0 %v1382_v14  ;;  %2043 = vmatmul.mubr.f32.vlgmr.msra.gmra.mrb[14].mxu1 %v1382_v14  ;;  %v1565_v58 = vmul.f32 %v1563_v54, %v1382_v14 }
 0x84f   :  { %v1457_v20 = vpop.f32.mrb[14].mxu0  ;;  %v1528_v21 = vpop.f32.mrb[14].mxu1 }
 0x850   :  { %v1532_v24 = vadd.f32 %v1457_v20, %v1386_v15  ;;  %v1459_v27 = vpop.f32.mrb[15].mxu0  ;;  %v2044_v28 = vpop.f32.mrb[15].mxu1 }
 0x851   :  { %v1539_v31 = vadd.f32 %v1459_v27, %v1387_v25 }
 0x852   :  { %v1627_v29 = vmul.f32 -1.442695, %v1532_v24 }
 0x853   :  { %v1628_v35 = vmul.f32 -1.442695, %v1539_v31 }
 0x854   :  { %2577 = vpow2.f32 %v1627_v29 }
 0x855   :  { %2579 = vpow2.f32 %v1628_v35 }
 0x85e   :  { %v2578_v36 = vpop.eup %2577 }
 0x85f   :  { %v1536_v37 = vadd.f32 1.0, %v2578_v36  ;;  %v2580_v39 = vpop.eup %2579 }
 0x860   :  { %v1543_v40 = vadd.f32 1.0, %v2580_v39 }
 0x861   :  { %2581 = vrcp.f32 %v1536_v37 }
 0x862   :  { %2583 = vrcp.f32 %v1543_v40 }
 0x86b   :  { %v2582_v41 = vpop.eup %2581 }
 0x86c   :  { %v1546_v44 = vmul.f32 %v2582_v41, %v1528_v21  ;;  %v2584_v47 = vpop.eup %2583 }
 0x86d   :  { %v1549_v48 = vsub.f32 1.0, %v2584_v47  ;;  %v1551_v51 = vmul.f32 %v2584_v47, %v1382_v14 }
 0x86e   :  { %v1547_v46 = vadd.f32 %v1546_v44, %v1388_v43 }
 0x870   :  { %2585 = vtanh.f32 %v1547_v46 }
 0x87a   :  { %v2586_v6 = vpop.eup %2585 }
 0x87b   :  { %v1550_v50 = vmul.f32 %v2586_v6, %v1549_v48 }
 0x87d   :  { %v1552_v52 = vadd.f32 %v1551_v51, %v1550_v50 }
 0x87f   :  { %v1558_v56 = vmul.f32 %v1556_v53, %v1552_v52 }
 0x881   :  { %v1566_v59 = vadd.f32 %v1565_v58, %v1558_v56 }
 0x883   :  { %1568 = vst [vmem:[#allocation8 + $0x38] sm:$0xff] %v1566_v59  ;;  %1573 = vst [vmem:[#allocation9] sm:$0xff] %v1566_v59 }
 0x884   :  { %2642 = shalt.err (!%p2639_p6)
}
 0x885   :  { %s2643_s9 = scalar_lea.hbm %s3174_s3, 1024 }
 0x886   :  { %p2644_p7 = scmp.ne.s32.totalorder %s3174_s3, %s2643_s9  ;;  %p2647_p8 = scmp.lt.u32.totalorder %s2643_s9, %s3174_s3 }
 0x888   :  { %p2649_p9 = pnand %p2647_p8, %p2644_p7 }
 0x88a   :  { %2652 = shalt.err (!%p2649_p9)
}
 0x88b   :  { %s2693_s13 = smov 128   ;;  %s2694_s2 = smov 8  }
 0x88c   :  { %1585 = dma.vmem_to_hbm [thread:$0]  %s1580_s29, 1024, %s3174_s3, [#allocation5], %s2693_s13, %s2693_s13, %s2694_s2  }
 0x88d   :  { %s2653_s16 = scalar_lea.vmem %s3140_s5, 128  ;;  %p2658_p11 = scmp.lt.s32.totalorder %s3140_s5, %s3140_s5 }
 0x88e   :  { %p2654_p10 = scmp.ne.s32.totalorder %s3140_s5, %s2653_s16  ;;  %p2659_p12 = scmp.lt.s32.totalorder %s2653_s16, %s2653_s16 }
 0x890   :  { %p2660_p13 = por %p2659_p12, %p2658_p11 }
 0x892   :  { %p2661_p0 = pnand %p2660_p13, %p2654_p10 }
 0x894   :  { %2664 = shalt.err (!%p2661_p0)
}
 0x895   :  { %s2665_s19 = scalar_lea.hbm %s3175_s4, 128 }
 0x896   :  { %p2666_p1 = scmp.ne.s32.totalorder %s3175_s4, %s2665_s19  ;;  %p2669_p2 = scmp.lt.u32.totalorder %s2665_s19, %s3175_s4 }
 0x898   :  { %p2671_p3 = pnand %p2669_p2, %p2666_p1 }
 0x89a   :  { %2674 = shalt.err (!%p2671_p3)
}
 0x89b   :  { %1595 = dma.vmem_to_hbm [thread:$0]  %s3140_s5, 128, %s3175_s4, [#allocation10]  }
 0x89c   :  { %2679 = dma.done.wait [#allocation5], 1024  }
 0x89d   :  { %2680 = vsyncadd [#allocation5], 4294966272 }
 0x89e   :  { %2681 = dma.done.wait [#allocation10], 128  }
 0x89f   :  { %2682 = vsyncadd [#allocation10], 4294967168 }
 0x8a0   :  { %1602 = vsyncpa [#allocation4], 1 }
 0x8a1   :  { %1603 = vsyncpa [#allocation7], 1 }
 0x8a2   :  { %1604 = vsyncpa [#allocation5], 1 }
 0x8a3   :  { %1605 = vsyncpa [#allocation10], 1 }

</bundles_post_ra>
